<compile_context>
chip_gen: v5e
topology: v5e:2x2
jax: 0.10.0
libtpu: 0.0.40
codegen_flags: <defaults>
</compile_context>

<pallas_src>
import functools

import numpy as np
import jax
import jax.numpy as jnp
from jax import lax
from jax.experimental import pallas as pl
from jax.experimental.pallas import tpu as pltpu

BN_EPS = 1e-5
# Set to jnp.bfloat16 on v6e/v7x for higher MXU throughput (f32 accumulate kept).
_CONV_COMPUTE_DTYPE = jnp.float32
_VMEM_LIMIT = 32 * 1024 * 1024
_TILE_BUDGET = 4 * 1024 * 1024   # per double-buffered conv tile set


def _round_up(x, m):
    return (x + m - 1) // m * m


# ---------------------------------------------------------------------------
# Fused Conv3x3 (pad=1, no bias) + BatchNorm(eval) + ReLU  -- direct conv,
# 9 shifted-window matmuls accumulated in VMEM (no HBM im2col).
# ---------------------------------------------------------------------------

def _conv3x3_bn_relu_kernel(x_ref, w_ref, s_ref, b_ref, o_ref, *, th, wd, cin):
    # x_ref: (1, th+2, wd+2, cin)   row band with 1-row / 1-col halo
    # w_ref: (9, cin, cp)           weight stack, k = dy*3 + dx
    # s_ref, b_ref: (1, cp)         folded BN scale / shift
    # o_ref: (1, th*wd, cp)         lane-dense output rows for this band
    cp = o_ref.shape[-1]
    x = x_ref[0]                                            # (th+2, wd+2, cin)
    acc = jnp.zeros((th * wd, cp), jnp.float32)
    for dy in range(3):
        for dx in range(3):
            patch = x[dy:dy + th, dx:dx + wd, :].reshape(th * wd, cin)
            acc = acc + jnp.dot(patch.astype(_CONV_COMPUTE_DTYPE),
                                w_ref[dy * 3 + dx].astype(_CONV_COMPUTE_DTYPE),
                                preferred_element_type=jnp.float32)
    y = acc * s_ref[...] + b_ref[...]
    o_ref[0] = jnp.maximum(y, 0.0).astype(o_ref.dtype)


def _pick_band_height(H, W, cin, cp, budget=_TILE_BUDGET):
    """Largest divisor of H whose conv tile (double buffered) fits the budget."""
    cands = [th for th in range(1, H + 1)
             if H % th == 0 and ((th * W) % 8 == 0 or th == H)]
    best = H
    for th in sorted(cands):
        in_b = (th + 2) * (W + 2) * cin * 4
        out_b = th * W * cp * 4
        if 2 * (in_b + out_b) <= budget:
            best = th
    return best


def _conv_weight_stack(w_oihw, cp):
    # (O, I, 3, 3) -> (9, I, cp) with zero-padded output channels (lane dense).
    O, I, kh, kw = w_oihw.shape
    w = jnp.transpose(w_oihw, (2, 3, 1, 0)).reshape(kh * kw, I, O)
    return jnp.pad(w, ((0, 0), (0, 0), (0, cp - O)))


def _bn_fold(gamma, beta, mean, var, cp, eps=BN_EPS):
    s = gamma / jnp.sqrt(var + eps)
    b = beta - mean * s
    c = s.shape[0]
    s = jnp.pad(s, (0, cp - c), constant_values=1.0)
    b = jnp.pad(b, (0, cp - c))
    return s.reshape(1, cp), b.reshape(1, cp)


def conv3x3_bn_relu(x_nhwc, w_oihw, scale, shift, cp):
    """x: (N,H,W,Cin) -> (N,H,W,cp) = relu(bn(conv3x3(x))), channels 0-padded."""
    N, H, W, Cin = x_nhwc.shape
    th = _pick_band_height(H, W, Cin, cp)
    nb = H // th
    xp = jnp.pad(x_nhwc, ((0, 0), (1, 1), (1, 1), (0, 0)))
    # Overlapping row bands with halo (1+2/th)x copy instead of 9x im2col.
    xb = jnp.stack([xp[:, i * th:i * th + th + 2] for i in range(nb)], axis=1)
    xb = xb.reshape(N * nb, th + 2, W + 2, Cin)
    wmat = _conv_weight_stack(w_oihw, cp)

    kern = functools.partial(_conv3x3_bn_relu_kernel, th=th, wd=W, cin=Cin)
    y = pl.pallas_call(
        kern,
        out_shape=jax.ShapeDtypeStruct((N * nb, th * W, cp), jnp.float32),
        grid=(N * nb,),
        in_specs=[
            pl.BlockSpec((1, th + 2, W + 2, Cin), lambda g: (g, 0, 0, 0)),
            pl.BlockSpec((9, Cin, cp), lambda g: (0, 0, 0)),
            pl.BlockSpec((1, cp), lambda g: (0, 0)),
            pl.BlockSpec((1, cp), lambda g: (0, 0)),
        ],
        out_specs=pl.BlockSpec((1, th * W, cp), lambda g: (g, 0, 0)),
        compiler_params=pltpu.CompilerParams(
            dimension_semantics=("parallel",),
            vmem_limit_bytes=_VMEM_LIMIT),
    )(xb, wmat, scale, shift)
    return y.reshape(N, H, W, cp)


# ---------------------------------------------------------------------------
# Fused attention tail: ChannelAttention + SpatialAttention + gating.
# d is read from HBM once; all lane-1 intermediates stay in VMEM.
# ---------------------------------------------------------------------------

def _fused_attention_kernel(d_ref, w1_ref, w2_ref, wsa_ref, o_ref, *, c_real):
    d = d_ref[0]                                            # (H, W, Cp)
    H, W, cp = d.shape
    hw = H * W

    # --- ChannelAttention: global avg/max pool -> shared MLP (one stacked pass)
    d2 = d.reshape(hw, cp)
    avg = jnp.sum(d2, axis=0, keepdims=True) * (1.0 / hw)   # (1, Cp)
    mx = jnp.max(d2, axis=0, keepdims=True)                 # (1, Cp)
    pooled = jnp.concatenate([avg, mx], axis=0)             # (2, Cp)
    h = jnp.maximum(jnp.dot(pooled, w1_ref[...],
                            preferred_element_type=jnp.float32), 0.0)
    z = jnp.dot(h, w2_ref[...], preferred_element_type=jnp.float32)  # (2, Cp)
    ca = jax.nn.sigmoid(z[0:1, :] + z[1:2, :]).reshape(1, 1, cp)

    # --- SpatialAttention: channel mean/max (padded channels are exact zeros
    # and d >= 0, so dividing the padded-lane sum by c_real and the padded max
    # are exact), then the 7x7 conv as 98 VPU shifted FMAs (no MXU, no im2col).
    ch_mean = jnp.sum(d, axis=-1, keepdims=True) * (1.0 / c_real)   # (H, W, 1)
    ch_max = jnp.max(d, axis=-1, keepdims=True)                     # (H, W, 1)

    def pad3(a):
        zr = jnp.zeros((3, W, 1), jnp.float32)
        a = jnp.concatenate([zr, a, zr], axis=0)                    # (H+6, W, 1)
        zc = jnp.zeros((H + 6, 3, 1), jnp.float32)
        return jnp.concatenate([zc, a, zc], axis=1)                 # (H+6, W+6, 1)

    pm = pad3(ch_mean)
    px = pad3(ch_max)
    sa = jnp.zeros((H, W, 1), jnp.float32)
    for dy in range(7):
        for dx in range(7):
            k = dy * 7 + dx
            sa = sa + pm[dy:dy + H, dx:dx + W, :] * wsa_ref[k] \
                    + px[dy:dy + H, dx:dx + W, :] * wsa_ref[49 + k]
    sa = jax.nn.sigmoid(sa)                                         # (H, W, 1)

    # out = sigmoid(ca)*d + sigmoid(sa)*d
    o_ref[0] = ((ca + sa) * d).astype(o_ref.dtype)


def fused_attention(d, w1p, w2p, wsa_flat, c_real):
    """d: (N,H,W,Cp) (channel-padded), returns gated output (N,H,W,Cp)."""
    N, H, W, cp = d.shape
    chp = w1p.shape[1]
    kern = functools.partial(_fused_attention_kernel, c_real=c_real)
    return pl.pallas_call(
        kern,
        out_shape=jax.ShapeDtypeStruct((N, H, W, cp), jnp.float32),
        grid=(N,),
        in_specs=[
            pl.BlockSpec((1, H, W, cp), lambda n: (n, 0, 0, 0)),
            pl.BlockSpec((cp, chp), lambda n: (0, 0)),
            pl.BlockSpec((chp, cp), lambda n: (0, 0)),
            pl.BlockSpec(memory_space=pltpu.MemorySpace.SMEM),   # 98 SA weights
        ],
        out_specs=pl.BlockSpec((1, H, W, cp), lambda n: (n, 0, 0, 0)),
        compiler_params=pltpu.CompilerParams(
            dimension_semantics=("parallel",),
            vmem_limit_bytes=_VMEM_LIMIT),
    )(d, w1p, w2p, wsa_flat)


# ---------------------------------------------------------------------------
# Forward pass (NCHW in / NCHW out)
# ---------------------------------------------------------------------------

def double_attention_forward(x_nchw, p):
    x = jnp.transpose(x_nchw, (0, 2, 3, 1)).astype(jnp.float32)     # NHWC
    N, H, W, Cin = x.shape
    Cout = p["w_conv1"].shape[0]
    Ch = p["w_ca1_t"].shape[1]
    CP = _round_up(Cout, 128)          # lane-dense channel padding
    CHP = _round_up(Ch, 128)

    # DecoderBlock: 2 x (Conv3x3 no-bias -> BN(eval) -> ReLU -> Dropout(eval))
    s1, b1 = _bn_fold(p["bn1_gamma"], p["bn1_beta"], p["bn1_mean"], p["bn1_var"], CP)
    y1 = conv3x3_bn_relu(x, p["w_conv1"], s1, b1, CP)               # (N,H,W,CP)
    s2, b2 = _bn_fold(p["bn2_gamma"], p["bn2_beta"], p["bn2_mean"], p["bn2_var"], CP)
    d = conv3x3_bn_relu(y1[..., :Cout], p["w_conv2"], s2, b2, CP)   # (N,H,W,CP)

    # Channel-padded MLP weights (padded rows/cols are zero -> exact).
    w1p = jnp.pad(p["w_ca1_t"], ((0, CP - Cout), (0, CHP - Ch)))
    w2p = jnp.pad(p["w_ca2_t"], ((0, CHP - Ch), (0, CP - Cout)))
    wsa = p["w_sa"].reshape(-1).astype(jnp.float32)                 # (98,) SMEM scalars

    out = fused_attention(d, w1p, w2p, wsa, Cout)                   # (N,H,W,CP)
    return jnp.transpose(out[..., :Cout], (0, 3, 1, 2))


# ---------------------------------------------------------------------------
# Pure-JAX reference (correctness check)
# ---------------------------------------------------------------------------

def reference_forward(x_nchw, p):
    x = jnp.transpose(x_nchw, (0, 2, 3, 1)).astype(jnp.float32)

    def conv(inp, w_oihw, pad):
        return lax.conv_general_dilated(
            inp, jnp.transpose(w_oihw, (2, 3, 1, 0)), (1, 1),
            [(pad, pad), (pad, pad)],
            dimension_numbers=("NHWC", "HWIO", "NHWC"),
            precision=lax.Precision.HIGHEST)

    def bn_relu(y, g, b, m, v):
        s = g / jnp.sqrt(v + BN_EPS)
        return jnp.maximum(y * s + (b - m * s), 0.0)

    y1 = bn_relu(conv(x, p["w_conv1"], 1),
                 p["bn1_gamma"], p["bn1_beta"], p["bn1_mean"], p["bn1_var"])
    d = bn_relu(conv(y1, p["w_conv2"], 1),
                p["bn2_gamma"], p["bn2_beta"], p["bn2_mean"], p["bn2_var"])

    avg = jnp.mean(d, axis=(1, 2))
    mx = jnp.max(d, axis=(1, 2))

    def mlp(v):
        return jnp.maximum(v @ p["w_ca1_t"], 0.0) @ p["w_ca2_t"]

    ca = jax.nn.sigmoid(mlp(avg) + mlp(mx))[:, None, None, :]

    pooled = jnp.concatenate([jnp.mean(d, axis=-1, keepdims=True),
                              jnp.max(d, axis=-1, keepdims=True)], axis=-1)
    sa = jax.nn.sigmoid(conv(pooled, p["w_sa"], 3))

    out = ca * d + sa * d
    return jnp.transpose(out, (0, 3, 1, 2))


# ---------------------------------------------------------------------------

if __name__ == "__main__":
    N, Cin, Cout, H, W = 2, 4, 8, 16, 16
    ratio = 4

    key = jax.random.PRNGKey(0)
    ks = jax.random.split(key, 13)
    p = {
        # DecoderBlock conv weights (PyTorch OIHW layout).
        "w_conv1": 0.2 * jax.random.normal(ks[0], (Cout, Cin, 3, 3), jnp.float32),
        "w_conv2": 0.2 * jax.random.normal(ks[1], (Cout, Cout, 3, 3), jnp.float32),
        # BatchNorm2d params / running stats (eval mode).
        "bn1_gamma": 1.0 + 0.1 * jax.random.normal(ks[2], (Cout,), jnp.float32),
        "bn1_beta": 0.1 * jax.random.normal(ks[3], (Cout,), jnp.float32),
        "bn1_mean": 0.1 * jax.random.normal(ks[4], (Cout,), jnp.float32),
        "bn1_var": 0.5 + jax.random.uniform(ks[5], (Cout,), jnp.float32),
        "bn2_gamma": 1.0 + 0.1 * jax.random.normal(ks[6], (Cout,), jnp.float32),
        "bn2_beta": 0.1 * jax.random.normal(ks[7], (Cout,), jnp.float32),
        "bn2_mean": 0.1 * jax.random.normal(ks[8], (Cout,), jnp.float32),
        "bn2_var": 0.5 + jax.random.uniform(ks[9], (Cout,), jnp.float32),
        # ChannelAttention sharedMLP 1x1-conv weights, stored pre-transposed:
        # w_ca1_t == torch Conv2d(C, C//4, 1).weight.squeeze().T -> (C, C//4)
        "w_ca1_t": 0.3 * jax.random.normal(ks[10], (Cout, Cout // ratio), jnp.float32),
        "w_ca2_t": 0.3 * jax.random.normal(ks[11], (Cout // ratio, Cout), jnp.float32),
        # SpatialAttention 7x7 conv weight (OIHW), O=1, I=2.
        "w_sa": 0.1 * jax.random.normal(ks[12], (1, 2, 7, 7), jnp.float32),
    }
    x = jax.random.normal(jax.random.PRNGKey(1), (N, Cin, H, W), jnp.float32)

    out = jax.block_until_ready(double_attention_forward(x, p))
    ref = jax.block_until_ready(reference_forward(x, p))

    assert out.shape == (N, Cout, H, W), out.shape
    np.testing.assert_allclose(np.asarray(out), np.asarray(ref),
                               rtol=5e-3, atol=5e-3)
    print("KERNEL_OK")
</pallas_src>

<mosaic_0001>
module attributes {stable_mosaic.version = 11 : i64} {
  func.func @_conv3x3_bn_relu_kernel(%arg0: i32, %arg1: memref<1x18x18x4xf32, #tpu.memory_space<vmem>>, %arg2: memref<9x4x128xf32, #tpu.memory_space<vmem>>, %arg3: memref<1x128xf32, #tpu.memory_space<vmem>>, %arg4: memref<1x128xf32, #tpu.memory_space<vmem>>, %arg5: memref<1x256x128xf32, #tpu.memory_space<vmem>>) attributes {dimension_semantics = [#tpu.dimension_semantics<parallel>], iteration_bounds = array<i64: 2>, scalar_prefetch = 0 : i64, scratch_operands = 0 : i64, tpu.core_type = #tpu.core_type<tc>, window_params = [{transform_indices = @transform_0, window_bounds = array<i64: 1, 18, 18, 4>}, {pipeline_mode = #tpu.pipeline_mode<synchronous>, transform_indices = @transform_1, window_bounds = array<i64: 9, 4, 128>}, {pipeline_mode = #tpu.pipeline_mode<synchronous>, transform_indices = @transform_2, window_bounds = array<i64: 1, 128>}, {pipeline_mode = #tpu.pipeline_mode<synchronous>, transform_indices = @transform_3, window_bounds = array<i64: 1, 128>}, {transform_indices = @transform_4, window_bounds = array<i64: 1, 256, 128>}]} {
    %c0 = arith.constant 0 : index
    %c0_0 = arith.constant 0 : index
    %c0_1 = arith.constant 0 : index
    %c0_2 = arith.constant 0 : index
    %0 = vector.load %arg1[%c0, %c0_0, %c0_1, %c0_2] : memref<1x18x18x4xf32, #tpu.memory_space<vmem>>, vector<1x18x18x4xf32>
    %1 = vector.shape_cast %0 : vector<1x18x18x4xf32> to vector<18x18x4xf32>
    %cst = arith.constant 0.000000e+00 : f32
    %2 = vector.broadcast %cst : f32 to vector<256x128xf32>
    %3 = vector.extract_strided_slice %1 {offsets = [0, 0, 0], sizes = [16, 16, 4], strides = [1, 1, 1]} : vector<18x18x4xf32> to vector<16x16x4xf32>
    %4 = vector.shape_cast %3 : vector<16x16x4xf32> to vector<256x4xf32>
    %c0_3 = arith.constant 0 : index
    %c0_4 = arith.constant 0 : index
    %c0_5 = arith.constant 0 : index
    %5 = vector.load %arg2[%c0_3, %c0_4, %c0_5] : memref<9x4x128xf32, #tpu.memory_space<vmem>>, vector<1x4x128xf32>
    %6 = vector.shape_cast %5 : vector<1x4x128xf32> to vector<4x128xf32>
    %cst_6 = arith.constant dense<0.000000e+00> : vector<256x128xf32>
    %7 = tpu.matmul %4, %6, %cst_6 {dimension_numbers = #tpu.dot_dimension_numbers<[1], [0], [0], [1], [0, 0, 1, 1], [], []>} : vector<256x4xf32>, vector<4x128xf32>, vector<256x128xf32> -> vector<256x128xf32>
    %8 = arith.addf %2, %7 : vector<256x128xf32>
    %9 = vector.extract_strided_slice %1 {offsets = [0, 1, 0], sizes = [16, 16, 4], strides = [1, 1, 1]} : vector<18x18x4xf32> to vector<16x16x4xf32>
    %10 = vector.shape_cast %9 : vector<16x16x4xf32> to vector<256x4xf32>
    %c1 = arith.constant 1 : index
    %c0_7 = arith.constant 0 : index
    %c0_8 = arith.constant 0 : index
    %11 = vector.load %arg2[%c1, %c0_7, %c0_8] : memref<9x4x128xf32, #tpu.memory_space<vmem>>, vector<1x4x128xf32>
    %12 = vector.shape_cast %11 : vector<1x4x128xf32> to vector<4x128xf32>
    %cst_9 = arith.constant dense<0.000000e+00> : vector<256x128xf32>
    %13 = tpu.matmul %10, %12, %cst_9 {dimension_numbers = #tpu.dot_dimension_numbers<[1], [0], [0], [1], [0, 0, 1, 1], [], []>} : vector<256x4xf32>, vector<4x128xf32>, vector<256x128xf32> -> vector<256x128xf32>
    %14 = arith.addf %8, %13 : vector<256x128xf32>
    %15 = vector.extract_strided_slice %1 {offsets = [0, 2, 0], sizes = [16, 16, 4], strides = [1, 1, 1]} : vector<18x18x4xf32> to vector<16x16x4xf32>
    %16 = vector.shape_cast %15 : vector<16x16x4xf32> to vector<256x4xf32>
    %c2 = arith.constant 2 : index
    %c0_10 = arith.constant 0 : index
    %c0_11 = arith.constant 0 : index
    %17 = vector.load %arg2[%c2, %c0_10, %c0_11] : memref<9x4x128xf32, #tpu.memory_space<vmem>>, vector<1x4x128xf32>
    %18 = vector.shape_cast %17 : vector<1x4x128xf32> to vector<4x128xf32>
    %cst_12 = arith.constant dense<0.000000e+00> : vector<256x128xf32>
    %19 = tpu.matmul %16, %18, %cst_12 {dimension_numbers = #tpu.dot_dimension_numbers<[1], [0], [0], [1], [0, 0, 1, 1], [], []>} : vector<256x4xf32>, vector<4x128xf32>, vector<256x128xf32> -> vector<256x128xf32>
    %20 = arith.addf %14, %19 : vector<256x128xf32>
    %21 = vector.extract_strided_slice %1 {offsets = [1, 0, 0], sizes = [16, 16, 4], strides = [1, 1, 1]} : vector<18x18x4xf32> to vector<16x16x4xf32>
    %22 = vector.shape_cast %21 : vector<16x16x4xf32> to vector<256x4xf32>
    %c3 = arith.constant 3 : index
    %c0_13 = arith.constant 0 : index
    %c0_14 = arith.constant 0 : index
    %23 = vector.load %arg2[%c3, %c0_13, %c0_14] : memref<9x4x128xf32, #tpu.memory_space<vmem>>, vector<1x4x128xf32>
    %24 = vector.shape_cast %23 : vector<1x4x128xf32> to vector<4x128xf32>
    %cst_15 = arith.constant dense<0.000000e+00> : vector<256x128xf32>
    %25 = tpu.matmul %22, %24, %cst_15 {dimension_numbers = #tpu.dot_dimension_numbers<[1], [0], [0], [1], [0, 0, 1, 1], [], []>} : vector<256x4xf32>, vector<4x128xf32>, vector<256x128xf32> -> vector<256x128xf32>
    %26 = arith.addf %20, %25 : vector<256x128xf32>
    %27 = vector.extract_strided_slice %1 {offsets = [1, 1, 0], sizes = [16, 16, 4], strides = [1, 1, 1]} : vector<18x18x4xf32> to vector<16x16x4xf32>
    %28 = vector.shape_cast %27 : vector<16x16x4xf32> to vector<256x4xf32>
    %c4 = arith.constant 4 : index
    %c0_16 = arith.constant 0 : index
    %c0_17 = arith.constant 0 : index
    %29 = vector.load %arg2[%c4, %c0_16, %c0_17] : memref<9x4x128xf32, #tpu.memory_space<vmem>>, vector<1x4x128xf32>
    %30 = vector.shape_cast %29 : vector<1x4x128xf32> to vector<4x128xf32>
    %cst_18 = arith.constant dense<0.000000e+00> : vector<256x128xf32>
    %31 = tpu.matmul %28, %30, %cst_18 {dimension_numbers = #tpu.dot_dimension_numbers<[1], [0], [0], [1], [0, 0, 1, 1], [], []>} : vector<256x4xf32>, vector<4x128xf32>, vector<256x128xf32> -> vector<256x128xf32>
    %32 = arith.addf %26, %31 : vector<256x128xf32>
    %33 = vector.extract_strided_slice %1 {offsets = [1, 2, 0], sizes = [16, 16, 4], strides = [1, 1, 1]} : vector<18x18x4xf32> to vector<16x16x4xf32>
    %34 = vector.shape_cast %33 : vector<16x16x4xf32> to vector<256x4xf32>
    %c5 = arith.constant 5 : index
    %c0_19 = arith.constant 0 : index
    %c0_20 = arith.constant 0 : index
    %35 = vector.load %arg2[%c5, %c0_19, %c0_20] : memref<9x4x128xf32, #tpu.memory_space<vmem>>, vector<1x4x128xf32>
    %36 = vector.shape_cast %35 : vector<1x4x128xf32> to vector<4x128xf32>
    %cst_21 = arith.constant dense<0.000000e+00> : vector<256x128xf32>
    %37 = tpu.matmul %34, %36, %cst_21 {dimension_numbers = #tpu.dot_dimension_numbers<[1], [0], [0], [1], [0, 0, 1, 1], [], []>} : vector<256x4xf32>, vector<4x128xf32>, vector<256x128xf32> -> vector<256x128xf32>
    %38 = arith.addf %32, %37 : vector<256x128xf32>
    %39 = vector.extract_strided_slice %1 {offsets = [2, 0, 0], sizes = [16, 16, 4], strides = [1, 1, 1]} : vector<18x18x4xf32> to vector<16x16x4xf32>
    %40 = vector.shape_cast %39 : vector<16x16x4xf32> to vector<256x4xf32>
    %c6 = arith.constant 6 : index
    %c0_22 = arith.constant 0 : index
    %c0_23 = arith.constant 0 : index
    %41 = vector.load %arg2[%c6, %c0_22, %c0_23] : memref<9x4x128xf32, #tpu.memory_space<vmem>>, vector<1x4x128xf32>
    %42 = vector.shape_cast %41 : vector<1x4x128xf32> to vector<4x128xf32>
    %cst_24 = arith.constant dense<0.000000e+00> : vector<256x128xf32>
    %43 = tpu.matmul %40, %42, %cst_24 {dimension_numbers = #tpu.dot_dimension_numbers<[1], [0], [0], [1], [0, 0, 1, 1], [], []>} : vector<256x4xf32>, vector<4x128xf32>, vector<256x128xf32> -> vector<256x128xf32>
    %44 = arith.addf %38, %43 : vector<256x128xf32>
    %45 = vector.extract_strided_slice %1 {offsets = [2, 1, 0], sizes = [16, 16, 4], strides = [1, 1, 1]} : vector<18x18x4xf32> to vector<16x16x4xf32>
    %46 = vector.shape_cast %45 : vector<16x16x4xf32> to vector<256x4xf32>
    %c7 = arith.constant 7 : index
    %c0_25 = arith.constant 0 : index
    %c0_26 = arith.constant 0 : index
    %47 = vector.load %arg2[%c7, %c0_25, %c0_26] : memref<9x4x128xf32, #tpu.memory_space<vmem>>, vector<1x4x128xf32>
    %48 = vector.shape_cast %47 : vector<1x4x128xf32> to vector<4x128xf32>
    %cst_27 = arith.constant dense<0.000000e+00> : vector<256x128xf32>
    %49 = tpu.matmul %46, %48, %cst_27 {dimension_numbers = #tpu.dot_dimension_numbers<[1], [0], [0], [1], [0, 0, 1, 1], [], []>} : vector<256x4xf32>, vector<4x128xf32>, vector<256x128xf32> -> vector<256x128xf32>
    %50 = arith.addf %44, %49 : vector<256x128xf32>
    %51 = vector.extract_strided_slice %1 {offsets = [2, 2, 0], sizes = [16, 16, 4], strides = [1, 1, 1]} : vector<18x18x4xf32> to vector<16x16x4xf32>
    %52 = vector.shape_cast %51 : vector<16x16x4xf32> to vector<256x4xf32>
    %c8 = arith.constant 8 : index
    %c0_28 = arith.constant 0 : index
    %c0_29 = arith.constant 0 : index
    %53 = vector.load %arg2[%c8, %c0_28, %c0_29] : memref<9x4x128xf32, #tpu.memory_space<vmem>>, vector<1x4x128xf32>
    %54 = vector.shape_cast %53 : vector<1x4x128xf32> to vector<4x128xf32>
    %cst_30 = arith.constant dense<0.000000e+00> : vector<256x128xf32>
    %55 = tpu.matmul %52, %54, %cst_30 {dimension_numbers = #tpu.dot_dimension_numbers<[1], [0], [0], [1], [0, 0, 1, 1], [], []>} : vector<256x4xf32>, vector<4x128xf32>, vector<256x128xf32> -> vector<256x128xf32>
    %56 = arith.addf %50, %55 : vector<256x128xf32>
    %c0_31 = arith.constant 0 : index
    %c0_32 = arith.constant 0 : index
    %57 = vector.load %arg3[%c0_31, %c0_32] : memref<1x128xf32, #tpu.memory_space<vmem>>, vector<1x128xf32>
    %58 = vector.broadcast %57 : vector<1x128xf32> to vector<256x128xf32>
    %59 = arith.mulf %56, %58 : vector<256x128xf32>
    %c0_33 = arith.constant 0 : index
    %c0_34 = arith.constant 0 : index
    %60 = vector.load %arg4[%c0_33, %c0_34] : memref<1x128xf32, #tpu.memory_space<vmem>>, vector<1x128xf32>
    %61 = vector.broadcast %60 : vector<1x128xf32> to vector<256x128xf32>
    %62 = arith.addf %59, %61 : vector<256x128xf32>
    %cst_35 = arith.constant 0.000000e+00 : f32
    %63 = vector.broadcast %cst_35 : f32 to vector<256x128xf32>
    %64 = arith.maximumf %62, %63 : vector<256x128xf32>
    %c0_36 = arith.constant 0 : index
    %c0_37 = arith.constant 0 : index
    %c0_38 = arith.constant 0 : index
    %65 = vector.load %arg5[%c0_36, %c0_37, %c0_38] : memref<1x256x128xf32, #tpu.memory_space<vmem>>, vector<1x256x128xf32>
    %66 = vector.shape_cast %65 : vector<1x256x128xf32> to vector<256x128xf32>
    %67 = vector.shape_cast %64 : vector<256x128xf32> to vector<1x256x128xf32>
    tpu.vector_store %arg5[%c0_36, %c0_37, %c0_38], %67 {strides = array<i32>} : memref<1x256x128xf32, #tpu.memory_space<vmem>>, vector<1x256x128xf32>,
    return
  }
  func.func @transform_0(%arg0: i32) -> (i32, i32, i32, i32) {
    %c0_i32 = arith.constant 0 : i32
    %c0_i32_0 = arith.constant 0 : i32
    %c0_i32_1 = arith.constant 0 : i32
    %c0_i32_2 = arith.constant 0 : i32
    return %arg0, %c0_i32, %c0_i32_0, %c0_i32_1 : i32, i32, i32, i32
  }
  func.func @transform_1(%arg0: i32) -> (i32, i32, i32) {
    %c0_i32 = arith.constant 0 : i32
    %c0_i32_0 = arith.constant 0 : i32
    %c0_i32_1 = arith.constant 0 : i32
    %c0_i32_2 = arith.constant 0 : i32
    return %c0_i32, %c0_i32_0, %c0_i32_1 : i32, i32, i32
  }
  func.func @transform_2(%arg0: i32) -> (i32, i32) {
    %c0_i32 = arith.constant 0 : i32
    %c0_i32_0 = arith.constant 0 : i32
    %c0_i32_1 = arith.constant 0 : i32
    return %c0_i32, %c0_i32_0 : i32, i32
  }
  func.func @transform_3(%arg0: i32) -> (i32, i32) {
    %c0_i32 = arith.constant 0 : i32
    %c0_i32_0 = arith.constant 0 : i32
    %c0_i32_1 = arith.constant 0 : i32
    return %c0_i32, %c0_i32_0 : i32, i32
  }
  func.func @transform_4(%arg0: i32) -> (i32, i32, i32) {
    %c0_i32 = arith.constant 0 : i32
    %c0_i32_0 = arith.constant 0 : i32
    %c0_i32_1 = arith.constant 0 : i32
    return %arg0, %c0_i32, %c0_i32_0 : i32, i32, i32
  }
}

</mosaic_0001>

<bundles_post_ra>
// kernel: tpu_custom_call.1
= control target key start
LH: loop header
LB: loop body
LE: loop exit
PB: predicated region body
PF: predicated region fallthrough
CT: control target
= control target key end

     0   :  { %9 = vsyncpa [#allocation3], 0  ;;  %s4129_s0 = inlined_call_operand.vmem [shape: f32[2,18,18,4], index: 0, kind: input, shape index: {}]   ;;  %s4130_s1 = inlined_call_operand.vmem [shape: f32[9,4,128], index: 1, kind: input, shape index: {}]   ;;  %s4131_s2 = inlined_call_operand.vmem [shape: f32[1,128], index: 2, kind: input, shape index: {}]   ;;  %s4132_s3 = inlined_call_operand.vmem [shape: f32[1,128], index: 3, kind: input, shape index: {}]   ;;  %s4133_s4 = inlined_call_operand.hbm [shape: f32[2,256,128], index: 4, kind: output, shape index: {}]  }
   0x1   :  { %11 = vsyncpa [#allocation3 + $0x1], 0  ;;  %s2682_s15 = smov 0   ;;  %s2684_s16 = smov 0  }
   0x2   :  { %s2686_s17 = smov 0   ;;  %s2688_s18 = smov 0  }
   0x3 LB: > { %s2703_s19 = sadd.s32 4294967295, %s2653_s18   ;;  %s2203_s20 = sadd.s32 4294967294, %s2653_s18   ;;  %s2653_s18 = sphi %s2688_s18, %s4352_s18   ;;  %s2649_s17 = sphi %s2686_s17, %s4351_s17   ;;  %s2645_s16 = sphi %s2684_s16, %s4350_s16   ;;  %s2641_s15 = sphi %s2682_s15, %s4349_s15  }
   0x4   : > { %s2707_s21 = sadd.s32 1, %s2653_s18   ;;  %s113_s22 = sadd.s32 1, %s2649_s17 }
   0x5   : > { %s110_s23 = ssub.s32 %s2653_s18, %s2707_s21  ;;  %p123_p0 = scmp.ne.s32.totalorder %s2649_s17, %s2645_s16 }
   0x6   : > { %p111_p1 = scmp.eq.s32.totalorder %s110_s23, 0  ;;  %p124_p2 = scmp.eq.s32.totalorder %s2703_s19, 1 }
   0x7   : > { %p129_p3 = scmp.ne.s32.totalorder %s2645_s16, %s2641_s15  ;;  %p130_p4 = scmp.eq.s32.totalorder %s2203_s20, 1 }
   0x8   : > { %s2718_s24 = scalar_select %p111_p1, %s2649_s17, %s113_s22  }
   0x9   : > { %p2720_p5 = por %p124_p2, %p123_p0  ;;  %p2724_p6 = por %p130_p4, %p129_p3 }
   0xa   : > { %p2206_p7 = scmp.ge.s32.totalorder %s2653_s18, 1  ;;  %p165_p8 = scmp.lt.s32.totalorder %s2653_s18, 3 }
   0xc   : > { %p166_p9 = pnand %p2206_p7, %p165_p8 }
   0xe   : > { %169 = sbr.rel (%p166_p9) target bundleno = 747 (0x2eb), region = 36 }
  0x13   : > { %v2209_v0 = vld [vmem:[%s4130_s1 + $0x4] sm:$0xf]  ;;  %vm447_vm0 = vcmask 1043456   ;;  %p191_p10 = scmp.lt.s32.totalorder %s2703_s19, 1  ;;  %v2276_v1 = vld [vmem:[%s4130_s1 + $0x8] sm:$0xf] }
  0x14   : > { %2520 = vmatpush.msk.msra.mxu1 %vm447_vm0, %v2209_v0  ;;  %2521 = vmatpush.msk.msra.mxu2 %vm447_vm0, %v2209_v0  ;;  %v2310_v2 = vld [vmem:[%s4130_s1 + $0xc] sm:$0xf]  ;;  %v250_v3 = vld [vmem:[%s4130_s1] sm:$0xf]  ;;  %v2344_v4 = vld [vmem:[%s4130_s1 + $0x10] sm:$0xf] }
  0x15   : > { %s192_s9 = scalar_select %p191_p10, %s2703_s19, 1  ;;  %2522 = vmatpush.msk.msra.mxu3 %vm447_vm0, %v2209_v0  ;;  %2210 = vmatpush.msk.msra.mxu0 %vm447_vm0, %v2209_v0  ;;  %vm299_vm1 = vcmask 1046528   ;;  %vm382_vm2 = vcmask 31744   ;;  %vm744_vm3 = vcmask 1045504  }
  0x16   : > { %2277 = vmatpush.msk.msrb.mxu2 %vm447_vm0, %v2276_v1  ;;  %2243 = vmatpush.msk.msrb.mxu1 %vm447_vm0, %v250_v3  ;;  %s2519_s14 = sshll.u32 %s2703_s19, 8  ;;  %s2611_s7 = scalar_lea.hbm %s4133_s4, 512 }
  0x17   : > { %2311 = vmatpush.msk.msrb.mxu3 %vm447_vm0, %v2310_v2  ;;  %s2523_s12 = smul.u32 432, %s192_s9  ;;  %2345 = vmatpush.msk.msrb.mxu0 %vm447_vm0, %v2344_v4  ;;  %s188_s9 = sand.u32 1, %s2645_s16  }
  0x18   : > { %s2137_s23 = scalar_lea.hbm %s4133_s4, %s2519_s14  ;;  %s2126_s19 = scalar_lea.sflag [#allocation3], %s188_s9 }
  0x19   : > { %s2758_s20 = scalar_lea.vmem %s4129_s0, %s2523_s12  ;;  %s2207_s12 = sshll.u32 %s188_s9, 8 }
  0x1a   : > { %v2761_v5 = vld [vmem:[%s2758_s20 + $0x60] sm:$0xff]  ;;  %v2764_v6 = vld [vmem:[%s2758_s20 + $0x68] sm:$0xff]  ;;  %v2785_v17 = vld [vmem:[%s2758_s20 + $0x70] sm:$0x3]  ;;  %s3857_s13 = scalar_lea.vmem [#allocation2], %s2207_s12  ;;  %s2140_s28 = sshll.u32 %s2137_s23, 4  ;;  %s2141_s28 = int_to_ptr.hbm [resolvable:$true] %s2140_s28 }
  0x1b   : > { %v2767_v7 = vld [vmem:[%s2758_s20 + $0xc0] sm:$0xff]  ;;  %v320_v8 = vrot.slane %v2761_v5, 1  ;;  %v321_v9 = vrot.slane %v2764_v6, 1  ;;  %v2772_v10 = vld [vmem:[%s2758_s20 + $0xc8] sm:$0xff]  ;;  %v2794_v20 = vld [vmem:[%s2758_s20 + $0xd0] sm:$0x3] }
  0x1c   : > { %v340_v11 = vrot.slane %v2767_v7, 1  ;;  %v2776_v12 = vld [vmem:[%s2758_s20 + $0x120] sm:$0xff]  ;;  %v2779_v13 = vld [vmem:[%s2758_s20 + $0x128] sm:$0xff]  ;;  %v341_v14 = vrot.slane %v2772_v10, 1  ;;  %v2810_v26 = vld [vmem:[%s2758_s20 + $0x130] sm:$0x3] }
  0x1d   : > { %4211 = vst [vmem:[#allocation5_spill] sm:$0xff] %v2776_v12  ;;  %v360_v15 = vrot.slane %v2776_v12, 1  ;;  %v361_v16 = vrot.slane %v2779_v13, 1  ;;  %v2788_v18 = vld [vmem:[%s2758_s20] sm:$0xff]  ;;  %v2791_v19 = vsel %vm299_vm1, %v320_v8, %v321_v9  ;;  %v2797_v21 = vld [vmem:[%s2758_s20 + $0x8] sm:$0xff]  ;;  %v323_v27 = vrot.slane %v2785_v17, 1 }
  0x1e   : > { %4212 = vst [vmem:[#allocation6_spill] sm:$0xff] %v2779_v13  ;;  %v300_v22 = vrot.slane %v2788_v18, 1  ;;  %2219 = vmatmul.msk.f32.vlgmr.msra.gmra.mxu1 %vm382_vm2, %v2791_v19  ;;  %v2803_v23 = vsel %vm299_vm1, %v340_v11, %v341_v14  ;;  %v301_v25 = vrot.slane %v2797_v21, 1  ;;  %v2818_v28 = vld [vmem:[%s2758_s20 + $0x10] sm:$0x3]  ;;  %v343_v29 = vrot.slane %v2794_v20, 1 }
  0x1f   : > { %4213 = vst [vmem:[#allocation7_spill] sm:$0xff] %v2803_v23  ;;  %v2806_v24 = vsel %vm299_vm1, %v360_v15, %v361_v16  ;;  %2227 = vmatmul.msk.f32.vlgmr.msra.gmra.mxu2 %vm382_vm2, %v2803_v23  ;;  %v363_v31 = vrot.slane %v2810_v26, 1  ;;  %v303_v32 = vrot.slane %v2818_v28, 1  ;;  %v2826_v33 = vsel %vm299_vm1, %v321_v9, %v323_v27  ;;  %v2835_v36 = vld [vmem:[%s2758_s20 + $0x78] sm:$0xff]  ;;  %v2838_v37 = vld [vmem:[%s2758_s20 + $0x80] sm:$0xff]  ;;  %v2920_v4 = vld [vmem:[%s2758_s20 + $0x90] sm:$0xff] }
  0x20   : > { %4214 = vst [vmem:[#allocation8_spill] sm:$0xff] %v2806_v24  ;;  %2235 = vmatmul.msk.f32.vlgmr.msra.gmra.mxu3 %vm382_vm2, %v2806_v24  ;;  %v302_v30 = vsel %vm299_vm1, %v300_v22, %v301_v25  ;;  %v2829_v34 = vsel %vm299_vm1, %v341_v14, %v343_v29  ;;  %v2841_v38 = vld [vmem:[%s2758_s20 + $0xd8] sm:$0xff]  ;;  %v2844_v39 = vld [vmem:[%s2758_s20 + $0xe0] sm:$0xff]  ;;  %v325_v43 = vrot.slane %v2835_v36, 1  ;;  %v326_v44 = vrot.slane %v2838_v37, 1  ;;  %v2926_v9 = vld [vmem:[%s2758_s20 + $0xf0] sm:$0xff] }
  0x21   : > { %4215 = vst [vmem:[#allocation9_spill] sm:$0xff] %v2810_v26  ;;  %2211 = vmatmul.msk.f32.vlgmr.msra.gmra.mxu0 %vm382_vm2, %v302_v30  ;;  %v2832_v35 = vsel %vm299_vm1, %v361_v16, %v363_v31  ;;  %v2847_v40 = vld [vmem:[%s2758_s20 + $0x138] sm:$0xff]  ;;  %v2850_v41 = vld [vmem:[%s2758_s20 + $0x140] sm:$0xff]  ;;  %v304_v42 = vsel %vm299_vm1, %v301_v25, %v303_v32  ;;  %v345_v47 = vrot.slane %v2841_v38, 1  ;;  %v346_v48 = vrot.slane %v2844_v39, 1  ;;  %v2932_v14 = vld [vmem:[%s2758_s20 + $0x150] sm:$0xff] }
  0x22   : > { %4216 = vst [vmem:[#allocation10_spill] sm:$0xff] %v2826_v33  ;;  %v2862_v45 = vld [vmem:[%s2758_s20 + $0x18] sm:$0xff]  ;;  %v2865_v46 = vld [vmem:[%s2758_s20 + $0x20] sm:$0xff]  ;;  %v365_v49 = vrot.slane %v2847_v40, 1  ;;  %v366_v50 = vrot.slane %v2850_v41, 1  ;;  %v2875_v53 = vsel %vm299_vm1, %v325_v43, %v326_v44  ;;  %v330_v22 = vrot.slane %v2920_v4, 1 }
  0x23   : > { %4217 = vst [vmem:[#allocation11_spill] sm:$0xff] %v2829_v34  ;;  %v305_v51 = vrot.slane %v2862_v45, 1  ;;  %v306_v52 = vrot.slane %v2865_v46, 1  ;;  %v2878_v54 = vsel %vm299_vm1, %v345_v47, %v346_v48  ;;  %v2884_v56 = vld [vmem:[%s2758_s20 + $0x88] sm:$0x3]  ;;  %v2923_v8 = vld [vmem:[%s2758_s20 + $0x98] sm:$0xff] }
  0x24   : > { %4218 = vst [vmem:[#allocation12_spill] sm:$0xff] %v2832_v35  ;;  %v2881_v55 = vsel %vm299_vm1, %v365_v49, %v366_v50  ;;  %v2887_v57 = vld [vmem:[%s2758_s20 + $0xe8] sm:$0x3]  ;;  %v328_v60 = vrot.slane %v2884_v56, 1  ;;  %v2929_v11 = vld [vmem:[%s2758_s20 + $0xf8] sm:$0xff]  ;;  %v331_v25 = vrot.slane %v2923_v8, 1 }
  0x25   : > { %4219 = vst [vmem:[#allocation13_spill] sm:$0xff] %v2847_v40  ;;  %v2890_v58 = vld [vmem:[%s2758_s20 + $0x148] sm:$0x3]  ;;  %v2895_v59 = vsel %vm299_vm1, %v305_v51, %v306_v52  ;;  %v348_v62 = vrot.slane %v2887_v57, 1  ;;  %v2935_v15 = vld [vmem:[%s2758_s20 + $0x158] sm:$0xff]  ;;  %v2949_v27 = vld [vmem:[%s2758_s20 + $0x30] sm:$0xff] }
  0x26   : > { %4220 = vst [vmem:[#allocation14_spill] sm:$0xff] %v2850_v41  ;;  %2220 = vmatmul.msk.f32.gmra.mxu1 %vm382_vm2, %v2826_v33  ;;  %v2903_v61 = vld [vmem:[%s2758_s20 + $0x28] sm:$0x3]  ;;  %v368_v63 = vrot.slane %v2890_v58, 1  ;;  %v2911_v1 = vsel %vm299_vm1, %v326_v44, %v328_v60  ;;  %v2952_v29 = vld [vmem:[%s2758_s20 + $0x38] sm:$0xff]  ;;  %v350_v30 = vrot.slane %v2926_v9, 1  ;;  %v2963_v47 = vsel %vm299_vm1, %v330_v22, %v331_v25 }
  0x27   : > { %2228 = vmatmul.msk.f32.gmra.mxu2 %vm382_vm2, %v2829_v34  ;;  %4221 = vst [vmem:[#allocation15_spill] sm:$0xff] %v2875_v53  ;;  %v308_v0 = vrot.slane %v2903_v61, 1  ;;  %v2914_v2 = vsel %vm299_vm1, %v346_v48, %v348_v62  ;;  %v351_v31 = vrot.slane %v2929_v11, 1  ;;  %v370_v32 = vrot.slane %v2932_v14, 1  ;;  %v2966_v48 = vld [vmem:[%s2758_s20 + $0xa0] sm:$0x3] }
  0x28   : > { %2236 = vmatmul.msk.f32.gmra.mxu3 %vm382_vm2, %v2832_v35  ;;  %4222 = vst [vmem:[#allocation16_spill] sm:$0xff] %v2881_v55  ;;  %v2917_v3 = vsel %vm299_vm1, %v366_v50, %v368_v63  ;;  %v310_v43 = vrot.slane %v2949_v27, 1  ;;  %v311_v44 = vrot.slane %v2952_v29, 1  ;;  %v2975_v51 = vld [vmem:[%s2758_s20 + $0x100] sm:$0x3]  ;;  %v333_v60 = vrot.slane %v2966_v48, 1 }
  0x29   : > { %2212 = vmatmul.msk.f32.gmra.mxu0 %vm382_vm2, %v304_v42  ;;  %4223 = vst [vmem:[#allocation17_spill] sm:$0xff] %v2890_v58  ;;  %v2940_v16 = vsel %vm299_vm1, %v306_v52, %v308_v0  ;;  %v371_v42 = vrot.slane %v2935_v15, 1  ;;  %v2969_v49 = vsel %vm299_vm1, %v350_v30, %v351_v31  ;;  %v2978_v52 = vld [vmem:[%s2758_s20 + $0x160] sm:$0x3]  ;;  %v2412_v0 = vld [vmem:[%s4130_s1 + $0x18] sm:$0xf] }
  0x2a   : > { %4224 = vst [vmem:[#allocation18_spill] sm:$0xff] %v2911_v1  ;;  %v2984_v62 = vsel %vm299_vm1, %v310_v43, %v311_v44  ;;  %v2987_v63 = vld [vmem:[%s2758_s20 + $0x40] sm:$0x3]  ;;  %v2446_v22 = vld [vmem:[%s4130_s1 + $0x1c] sm:$0xf]  ;;  %v373_v43 = vrot.slane %v2978_v52, 1  ;;  %2413 = vmatpush.msk.msra.mxu2 %vm447_vm0, %v2412_v0 }
  0x2b   : > { %4225 = vst [vmem:[#allocation19_spill] sm:$0xff] %v2917_v3  ;;  %v2972_v50 = vsel %vm299_vm1, %v370_v32, %v371_v42  ;;  %v2378_v30 = vld [vmem:[%s4130_s1 + $0x14] sm:$0xf]  ;;  %v353_v32 = vrot.slane %v2975_v51, 1  ;;  %2447 = vmatpush.msk.msra.mxu3 %vm447_vm0, %v2446_v22  ;;  %v3020_v0 = vld [vmem:[%s2758_s20 + $0xa8] sm:$0xff]  ;;  %s2138_s27 = sshll.u32 %s3857_s13, 4  ;;  %s2139_s27 = int_to_ptr.vmem [resolvable:$true] %s2138_s27 }
  0x2c   : > { %4226 = vst [vmem:[#allocation20_spill] sm:$0xff] %v2932_v14  ;;  %2379 = vmatpush.msk.msra.mxu1 %vm447_vm0, %v2378_v30  ;;  %v3023_v22 = vld [vmem:[%s2758_s20 + $0xb0] sm:$0xff]  ;;  %v3026_v14 = vld [vmem:[%s2758_s20 + $0x108] sm:$0xff]  ;;  %v3079_v24 = vld [vmem:[%s2758_s20 + $0x118] sm:$0x3]  ;;  %s2605_s29 = sshra.s32 %s2141_s28, 4  ;;  %s2606_s29 = int_to_ptr.hbm [resolvable:$true] %s2605_s29 }
  0x2d   : > { %4227 = vst [vmem:[#allocation21_spill] sm:$0xff] %v2935_v15  ;;  %v313_v15 = vrot.slane %v2987_v63, 1  ;;  %v3014_v58 = vsel %vm299_vm1, %v351_v31, %v353_v32  ;;  %v3029_v30 = vld [vmem:[%s2758_s20 + $0x110] sm:$0xff]  ;;  %v335_v31 = vrot.slane %v3020_v0, 1  ;;  %s2607_s30 = scalar_lea.hbm %s2606_s29, 256  ;;  %p2612_p0 = scmp.lt.s32.totalorder %s2606_s29, %s4133_s4 }
  0x2e   : > { %2221 = vmatmul.msk.f32.gmra.mxu1 %vm382_vm2, %v2875_v53  ;;  %4228 = vst [vmem:[#allocation22_spill] sm:$0xff] %v2963_v47  ;;  %v3035_v41 = vld [vmem:[%s2758_s20 + $0x170] sm:$0xff]  ;;  %p2608_p11 = scmp.ne.s32.totalorder %s2606_s29, %s2607_s30  ;;  %p2613_p1 = scmp.lt.s32.totalorder %s2611_s7, %s2607_s30 }
  0x2f   : > { %2229 = vmatmul.msk.f32.gmra.mxu2 %vm382_vm2, %v2878_v54  ;;  %4229 = vst [vmem:[#allocation23_spill] sm:$0xff] %v2972_v50  ;;  %v3052_v32 = vld [vmem:[%s2758_s20 + $0x50] sm:$0xff] }
  0x30   : > { %2237 = vmatmul.msk.f32.gmra.mxu3 %vm382_vm2, %v2881_v55  ;;  %4230 = vst [vmem:[#allocation24_spill] sm:$0xff] %v2975_v51  ;;  %v376_v55 = vrot.slane %v3035_v41, 1  ;;  %v316_v40 = vrot.slane %v3052_v32, 1  ;;  %p2609_p12 = pnand %p2608_p11, %p2720_p5  ;;  %p2614_p2 = por %p2613_p1, %p2612_p0 }
  0x31   : > { %2213 = vmatmul.msk.f32.gmra.mxu0 %vm382_vm2, %v2895_v59  ;;  %4231 = vst [vmem:[#allocation25_spill] sm:$0xff] %v2978_v52  ;;  %v3017_v52 = vsel %vm299_vm1, %v371_v42, %v373_v43  ;;  %v336_v42 = vrot.slane %v3023_v22, 1  ;;  %v356_v43 = vrot.slane %v3029_v30, 1 }
  0x32   : > { %4233 = vst [vmem:[#allocation27_spill] sm:$0xff] %v3017_v52  ;;  %p2610_p13 = pneg %p2609_p12 }
  0x33   : > { %4234 = vst [vmem:[#allocation28_spill] sm:$0xff] %v3029_v30  ;;  %v3067_v35 = vsel %vm299_vm1, %v335_v31, %v336_v42  ;;  %v3095_v31 = vld [vmem:[%s2758_s20 + $0x58] sm:$0x3] }
  0x34   : > { %4236 = vst [vmem:[#allocation30_spill] sm:$0xff] %v3035_v41  ;;  %v3076_v41 = vld [vmem:[%s2758_s20 + $0xb8] sm:$0x3]  ;;  %p2615_p3 = pnand %p2614_p2, %p2610_p13 }
  0x35   : > { %4237 = vst [vmem:[#allocation31_spill] sm:$0xff] %v3067_v35 }
  0x36   : > { %2222 = vmatmul.msk.f32.gmra.mxu1 %vm382_vm2, %v2911_v1  ;;  %4240 = vst [vmem:[#allocation34_spill] sm:$0xff] %v3079_v24 }
  0x37   : > { %2230 = vmatmul.msk.f32.gmra.mxu2 %vm382_vm2, %v2914_v2 }
  0x38   : > { %2238 = vmatmul.msk.f32.gmra.mxu3 %vm382_vm2, %v2917_v3  ;;  %v3032_v3 = vld [vmem:[%s2758_s20 + $0x168] sm:$0xff] }
  0x39   : > { %2214 = vmatmul.msk.f32.gmra.mxu0 %vm382_vm2, %v2940_v16  ;;  %4235 = vst [vmem:[#allocation29_spill] sm:$0xff] %v3032_v3 }
  0x3e   : > { %2223 = vmatmul.msk.f32.gmra.mxu1 %vm382_vm2, %v2963_v47 }
  0x3f   : > { %2231 = vmatmul.msk.f32.gmra.mxu2 %vm382_vm2, %v2969_v49 }
  0x40   : > { %2239 = vmatmul.msk.f32.gmra.mxu3 %vm382_vm2, %v2972_v50  ;;  %v3011_v50 = vsel %vm299_vm1, %v331_v25, %v333_v60  ;;  %v3040_v25 = vsel %vm299_vm1, %v311_v44, %v313_v15  ;;  %v3049_v60 = vld [vmem:[%s2758_s20 + $0x48] sm:$0xff]  ;;  %v2480_v15 = vld [vmem:[%s4130_s1 + $0x20] sm:$0xf]  ;;  %v355_v44 = vrot.slane %v3026_v14, 1 }
  0x41   : > { %2215 = vmatmul.msk.f32.gmra.mxu0 %vm382_vm2, %v2984_v62  ;;  %4232 = vst [vmem:[#allocation26_spill] sm:$0xff] %v3011_v50  ;;  %v315_v26 = vrot.slane %v3049_v60, 1 }
  0x42   : > { %2481 = vmatpush.msk.msra.mxu0 %vm447_vm0, %v2480_v15  ;;  %v3070_v13 = vsel %vm299_vm1, %v355_v44, %v356_v43  ;;  %v3082_v15 = vld [vmem:[%s2758_s20 + $0x178] sm:$0x3]  ;;  %v358_v44 = vrot.slane %v3079_v24, 1 }
  0x43   : > { %4238 = vst [vmem:[#allocation32_spill] sm:$0xff] %v3070_v13  ;;  %v3087_v12 = vsel %vm299_vm1, %v315_v26, %v316_v40  ;;  %v378_v30 = vrot.slane %v3082_v15, 1  ;;  %v318_v26 = vrot.slane %v3095_v31, 1 }
  0x45   : > { %v3114_v24 = vsel %vm299_vm1, %v316_v40, %v318_v26  ;;  %v748_v40 = vrot.slane %v2818_v28, 2  ;;  %v760_v26 = vrot.slane %v3049_v60, 2 }
  0x46   : > { %2224 = vmatmul.msk.f32.gmra.mxu1 %vm382_vm2, %v3011_v50 }
  0x47   : > { %2232 = vmatmul.msk.f32.gmra.mxu2 %vm382_vm2, %v3014_v58 }
  0x48   : > { %2240 = vmatmul.msk.f32.gmra.mxu3 %vm382_vm2, %v3017_v52  ;;  %v375_v52 = vrot.slane %v3032_v3, 1 }
  0x49   : > { %2216 = vmatmul.msk.f32.gmra.mxu0 %vm382_vm2, %v3040_v25 }
  0x4a   : > { %v3073_v3 = vsel %vm299_vm1, %v375_v52, %v376_v55  ;;  %v338_v52 = vrot.slane %v3076_v41, 1 }
  0x4b   : > { %4239 = vst [vmem:[#allocation33_spill] sm:$0xff] %v3073_v3 }
  0x4c   : > { %v3103_v51 = vsel %vm299_vm1, %v336_v42, %v338_v52  ;;  %v745_v42 = vrot.slane %v2788_v18, 2  ;;  %v751_v52 = vrot.slane %v2865_v46, 2 }
  0x4d   : > { %4241 = vst [vmem:[#allocation35_spill] sm:$0xff] %v3103_v51 }
  0x4e   : > { %2225 = vmatmul.msk.f32.gmra.mxu1 %vm382_vm2, %v3067_v35 }
  0x4f   : > { %2233 = vmatmul.msk.f32.gmra.mxu2 %vm382_vm2, %v3070_v13  ;;  %v3106_v13 = vsel %vm299_vm1, %v356_v43, %v358_v44  ;;  %v746_v43 = vrot.slane %v2797_v21, 2 }
  0x50   : > { %2241 = vmatmul.msk.f32.gmra.mxu3 %vm382_vm2, %v3073_v3  ;;  %v3109_v3 = vsel %vm299_vm1, %v376_v55, %v378_v30 }
  0x51   : > { %2217 = vmatmul.msk.f32.gmra.mxu0 %vm382_vm2, %v3087_v12  ;;  %4242 = vst [vmem:[#allocation36_spill] sm:$0xff] %v3109_v3  ;;  %v747_v55 = vsel %vm744_vm3, %v745_v42, %v746_v43  ;;  %v749_v30 = vsel %vm744_vm3, %v746_v43, %v748_v40  ;;  %v761_v42 = vrot.slane %v3052_v32, 2  ;;  %v763_v43 = vrot.slane %v3095_v31, 2 }
  0x52   : > { %v765_v40 = vrot.slane %v2761_v5, 2 }
  0x56   : > { %2226 = vmatmul.msk.f32.gmra.mxu1 %vm382_vm2, %v3103_v51 }
  0x57   : > { %2234 = vmatmul.msk.f32.gmra.mxu2 %vm382_vm2, %v3106_v13 }
  0x58   : > { %2242 = vmatmul.msk.f32.gmra.mxu3 %vm382_vm2, %v3109_v3 }
  0x59   : > { %2218 = vmatmul.msk.f32.gmra.mxu0 %vm382_vm2, %v3114_v24 }
  0x5e   : > { %2244 = vmatmul.msk.f32.vlgmr.msrb.gmra.mxu1 %vm382_vm2, %v2788_v18  ;;  %v750_v18 = vrot.slane %v2862_v45, 2 }
  0x5f   : > { %2278 = vmatmul.msk.f32.vlgmr.msrb.gmra.mxu2 %vm382_vm2, %v747_v55  ;;  %v3206_v55 = vsel %vm744_vm3, %v761_v42, %v763_v43 }
  0x60   : > { %2312 = vmatmul.msk.f32.vlgmr.msrb.gmra.mxu3 %vm382_vm2, %v2862_v45  ;;  %v3144_v28 = vsel %vm744_vm3, %v750_v18, %v751_v52 }
  0x61   : > { %2346 = vmatmul.msk.f32.vlgmr.msrb.gmra.mxu0 %vm382_vm2, %v2895_v59 }
  0x66   : > { %2245 = vmatmul.msk.f32.gmra.mxu1 %vm382_vm2, %v2797_v21  ;;  %v753_v21 = vrot.slane %v2903_v61, 2 }
  0x67   : > { %2279 = vmatmul.msk.f32.gmra.mxu2 %vm382_vm2, %v749_v30  ;;  %v766_v30 = vrot.slane %v2764_v6, 2 }
  0x68   : > { %2313 = vmatmul.msk.f32.gmra.mxu3 %vm382_vm2, %v2865_v46  ;;  %v3156_v59 = vsel %vm744_vm3, %v751_v52, %v753_v21  ;;  %v768_v21 = vrot.slane %v2785_v17, 2  ;;  %v770_v17 = vrot.slane %v2835_v36, 2 }
  0x69   : > { %2347 = vmatmul.msk.f32.gmra.mxu0 %vm382_vm2, %v2940_v16  ;;  %v756_v16 = vrot.slane %v2952_v29, 2  ;;  %v3221_v18 = vsel %vm744_vm3, %v765_v40, %v766_v30 }
  0x6a   : > { %4243 = vst [vmem:[#allocation37_spill] sm:$0xff] %v3221_v18 }
  0x6e   : > { %2246 = vmatmul.msk.f32.gmra.mxu1 %vm382_vm2, %v2862_v45  ;;  %v755_v45 = vrot.slane %v2949_v27, 2 }
  0x6f   : > { %2280 = vmatmul.msk.f32.gmra.mxu2 %vm382_vm2, %v3144_v28 }
  0x70   : > { %2314 = vmatmul.msk.f32.gmra.mxu3 %vm382_vm2, %v2949_v27  ;;  %v3169_v61 = vsel %vm744_vm3, %v755_v45, %v756_v16 }
  0x71   : > { %2348 = vmatmul.msk.f32.gmra.mxu0 %vm382_vm2, %v2984_v62 }
  0x76   : > { %2247 = vmatmul.msk.f32.gmra.mxu1 %vm382_vm2, %v2865_v46  ;;  %v758_v46 = vrot.slane %v2987_v63, 2  ;;  %v3194_v63 = vsel %vm744_vm3, %v760_v26, %v761_v42  ;;  %v771_v42 = vrot.slane %v2838_v37, 2 }
  0x77   : > { %2281 = vmatmul.msk.f32.gmra.mxu2 %vm382_vm2, %v3156_v59 }
  0x78   : > { %2315 = vmatmul.msk.f32.gmra.mxu3 %vm382_vm2, %v2952_v29  ;;  %v3181_v44 = vsel %vm744_vm3, %v756_v16, %v758_v46 }
  0x79   : > { %2349 = vmatmul.msk.f32.gmra.mxu0 %vm382_vm2, %v3040_v25 }
  0x7e   : > { %2248 = vmatmul.msk.f32.gmra.mxu1 %vm382_vm2, %v2949_v27 }
  0x7f   : > { %2282 = vmatmul.msk.f32.gmra.mxu2 %vm382_vm2, %v3169_v61 }
  0x80   : > { %2316 = vmatmul.msk.f32.gmra.mxu3 %vm382_vm2, %v3049_v60 }
  0x81   : > { %2350 = vmatmul.msk.f32.gmra.mxu0 %vm382_vm2, %v3087_v12 }
  0x86   : > { %2249 = vmatmul.msk.f32.gmra.mxu1 %vm382_vm2, %v2952_v29 }
  0x87   : > { %2283 = vmatmul.msk.f32.gmra.mxu2 %vm382_vm2, %v3181_v44 }
  0x88   : > { %2317 = vmatmul.msk.f32.gmra.mxu3 %vm382_vm2, %v3052_v32 }
  0x89   : > { %2351 = vmatmul.msk.f32.gmra.mxu0 %vm382_vm2, %v3114_v24 }
  0x8e   : > { %2250 = vmatmul.msk.f32.gmra.mxu1 %vm382_vm2, %v3049_v60 }
  0x8f   : > { %2284 = vmatmul.msk.f32.gmra.mxu2 %vm382_vm2, %v3194_v63 }
  0x90   : > { %2318 = vmatmul.msk.f32.gmra.mxu3 %vm382_vm2, %v2761_v5 }
  0x91   : > { %2352 = vmatmul.msk.f32.gmra.mxu0 %vm382_vm2, %v2791_v19 }
  0x96   : > { %2251 = vmatmul.msk.f32.gmra.mxu1 %vm382_vm2, %v3052_v32 }
  0x97   : > { %2285 = vmatmul.msk.f32.gmra.mxu2 %vm382_vm2, %v3206_v55 }
  0x98   : > { %2319 = vmatmul.msk.f32.gmra.mxu3 %vm382_vm2, %v2764_v6 }
  0x99   : > { %2353 = vmatmul.msk.f32.gmra.mxu0 %vm382_vm2, %v2826_v33 }
  0x9b   : > { %v3218_v31 = vpop.f32.mrf.mxu1 }
  0x9e   : > { %2252 = vmatmul.msk.f32.gmra.mxu1 %vm382_vm2, %v2761_v5  ;;  %v3225_v52 = vpop.f32.mrf.mxu0  ;;  %v3241_v5 = vsel %vm744_vm3, %v766_v30, %v768_v21  ;;  %v3262_v30 = vsel %vm744_vm3, %v770_v17, %v771_v42 }
  0x9f   : > { %2286 = vmatmul.msk.f32.gmra.mxu2 %vm382_vm2, %v3221_v18  ;;  %4245 = vst [vmem:[#allocation39_spill] sm:$0xff] %v3241_v5 }
  0xa0   : > { %2320 = vmatmul.msk.f32.gmra.mxu3 %vm382_vm2, %v2835_v36  ;;  %4247 = vst [vmem:[#allocation41_spill] sm:$0xff] %v3262_v30 }
  0xa1   : > { %2354 = vmatmul.msk.f32.gmra.mxu0 %vm382_vm2, %v2875_v53 }
  0xa2   : > { %v3234_v45 = vpop.f32.mrf.mxu2 }
  0xa3   : > { %v3236_v16 = vpop.f32.mrf.mxu3  ;;  %v3238_v46 = vpop.f32.mrf.mxu1 }
  0xa4   : > { %4244 = vst [vmem:[#allocation38_spill] sm:$0xff] %v3236_v16  ;;  %v773_v16 = vrot.slane %v2884_v56, 2  ;;  %v775_v56 = vrot.slane %v2920_v4, 2 }
  0xa6   : > { %2253 = vmatmul.msk.f32.gmra.mxu1 %vm382_vm2, %v2764_v6  ;;  %v3245_v26 = vpop.f32.mrf.mxu0 }
  0xa7   : > { %2287 = vmatmul.msk.f32.gmra.mxu2 %vm382_vm2, %v3241_v5 }
  0xa8   : > { %2321 = vmatmul.msk.f32.gmra.mxu3 %vm382_vm2, %v2838_v37 }
  0xa9   : > { %2355 = vmatmul.msk.f32.gmra.mxu0 %vm382_vm2, %v2911_v1 }
  0xaa   : > { %v3255_v43 = vpop.f32.mrf.mxu2 }
  0xab   : > { %v3257_v40 = vpop.f32.mrf.mxu3  ;;  %v3259_v6 = vpop.f32.mrf.mxu1 }
  0xac   : > { %4246 = vst [vmem:[#allocation40_spill] sm:$0xff] %v3257_v40 }
  0xae   : > { %2254 = vmatmul.msk.f32.gmra.mxu1 %vm382_vm2, %v2835_v36  ;;  %v3266_v21 = vpop.f32.mrf.mxu0  ;;  %v3282_v36 = vsel %vm744_vm3, %v771_v42, %v773_v16 }
  0xaf   : > { %2288 = vmatmul.msk.f32.gmra.mxu2 %vm382_vm2, %v3262_v30  ;;  %4249 = vst [vmem:[#allocation43_spill] sm:$0xff] %v3282_v36 }
  0xb0   : > { %2322 = vmatmul.msk.f32.gmra.mxu3 %vm382_vm2, %v2920_v4 }
  0xb1   : > { %2356 = vmatmul.msk.f32.gmra.mxu0 %vm382_vm2, %v2963_v47 }
  0xb2   : > { %v3275_v40 = vpop.f32.mrf.mxu2 }
  0xb3   : > { %v3277_v17 = vpop.f32.mrf.mxu3  ;;  %v3279_v1 = vpop.f32.mrf.mxu1 }
  0xb4   : > { %4248 = vst [vmem:[#allocation42_spill] sm:$0xff] %v3277_v17  ;;  %v776_v17 = vrot.slane %v2923_v8, 2 }
  0xb6   : > { %2255 = vmatmul.msk.f32.gmra.mxu1 %vm382_vm2, %v2838_v37  ;;  %v3286_v30 = vpop.f32.mrf.mxu0  ;;  %v3303_v47 = vsel %vm744_vm3, %v775_v56, %v776_v17 }
  0xb7   : > { %2289 = vmatmul.msk.f32.gmra.mxu2 %vm382_vm2, %v3282_v36  ;;  %4251 = vst [vmem:[#allocation45_spill] sm:$0xff] %v3303_v47 }
  0xb8   : > { %2323 = vmatmul.msk.f32.gmra.mxu3 %vm382_vm2, %v2923_v8 }
  0xb9   : > { %2357 = vmatmul.msk.f32.gmra.mxu0 %vm382_vm2, %v3011_v50  ;;  %v778_v50 = vrot.slane %v2966_v48, 2  ;;  %v780_v48 = vrot.slane %v3020_v0, 2 }
  0xba   : > { %v3296_v16 = vpop.f32.mrf.mxu2 }
  0xbb   : > { %v3298_v42 = vpop.f32.mrf.mxu3  ;;  %v3300_v37 = vpop.f32.mrf.mxu1 }
  0xbc   : > { %4250 = vst [vmem:[#allocation44_spill] sm:$0xff] %v3298_v42 }
  0xbe   : > { %2256 = vmatmul.msk.f32.gmra.mxu1 %vm382_vm2, %v2920_v4  ;;  %v3307_v36 = vpop.f32.mrf.mxu0  ;;  %v3323_v4 = vsel %vm744_vm3, %v776_v17, %v778_v50 }
  0xbf   : > { %2290 = vmatmul.msk.f32.gmra.mxu2 %vm382_vm2, %v3303_v47  ;;  %4253 = vst [vmem:[#allocation47_spill] sm:$0xff] %v3323_v4 }
  0xc0   : > { %2324 = vmatmul.msk.f32.gmra.mxu3 %vm382_vm2, %v3020_v0 }
  0xc1   : > { %2358 = vmatmul.msk.f32.gmra.mxu0 %vm382_vm2, %v3067_v35 }
  0xc2   : > { %v3316_v42 = vpop.f32.mrf.mxu2 }
  0xc3   : > { %v3318_v56 = vpop.f32.mrf.mxu3  ;;  %v3320_v53 = vpop.f32.mrf.mxu1 }
  0xc4   : > { %4252 = vst [vmem:[#allocation46_spill] sm:$0xff] %v3318_v56  ;;  %v781_v56 = vrot.slane %v3023_v22, 2 }
  0xc6   : > { %2257 = vmatmul.msk.f32.gmra.mxu1 %vm382_vm2, %v2923_v8  ;;  %v3327_v47 = vpop.f32.mrf.mxu0  ;;  %v3344_v35 = vsel %vm744_vm3, %v780_v48, %v781_v56 }
  0xc7   : > { %2291 = vmatmul.msk.f32.gmra.mxu2 %vm382_vm2, %v3323_v4  ;;  %4256 = vst [vmem:[#allocation50_spill] sm:$0xff] %v3344_v35 }
  0xc8   : > { %2325 = vmatmul.msk.f32.gmra.mxu3 %vm382_vm2, %v3023_v22 }
  0xc9   : > { %2359 = vmatmul.msk.f32.gmra.mxu0 %vm382_vm2, %v3103_v51  ;;  %v783_v51 = vrot.slane %v3076_v41, 2  ;;  %v785_v41 = vrot.slane %v2767_v7, 2 }
  0xca   : > { %v3337_v50 = vpop.f32.mrf.mxu2 }
  0xcb   : > { %4254 = vst [vmem:[#allocation48_spill] sm:$0xff] %v3337_v50  ;;  %v3339_v17 = vpop.f32.mrf.mxu3  ;;  %v3341_v8 = vpop.f32.mrf.mxu1 }
  0xcc   : > { %4255 = vst [vmem:[#allocation49_spill] sm:$0xff] %v3339_v17 }
  0xce   : > { %2258 = vmatmul.msk.f32.gmra.mxu1 %vm382_vm2, %v3020_v0  ;;  %v3348_v4 = vpop.f32.mrf.mxu0  ;;  %v3364_v0 = vsel %vm744_vm3, %v781_v56, %v783_v51 }
  0xcf   : > { %2292 = vmatmul.msk.f32.gmra.mxu2 %vm382_vm2, %v3344_v35  ;;  %4259 = vst [vmem:[#allocation53_spill] sm:$0xff] %v3364_v0 }
  0xd0   : > { %2326 = vmatmul.msk.f32.gmra.mxu3 %vm382_vm2, %v2767_v7 }
  0xd1   : > { %2360 = vmatmul.msk.f32.gmra.mxu0 %vm382_vm2, %v2803_v23 }
  0xd2   : > { %v3357_v17 = vpop.f32.mrf.mxu2 }
  0xd3   : > { %4257 = vst [vmem:[#allocation51_spill] sm:$0xff] %v3357_v17  ;;  %v3359_v48 = vpop.f32.mrf.mxu3  ;;  %v3361_v5 = vpop.f32.mrf.mxu1 }
  0xd4   : > { %4258 = vst [vmem:[#allocation52_spill] sm:$0xff] %v3359_v48  ;;  %v786_v48 = vrot.slane %v2772_v10, 2 }
  0xd6   : > { %2259 = vmatmul.msk.f32.gmra.mxu1 %vm382_vm2, %v3023_v22  ;;  %v3368_v35 = vpop.f32.mrf.mxu0  ;;  %v3383_v23 = vsel %vm744_vm3, %v785_v41, %v786_v48 }
  0xd7   : > { %2293 = vmatmul.msk.f32.gmra.mxu2 %vm382_vm2, %v3364_v0  ;;  %4262 = vst [vmem:[#allocation56_spill] sm:$0xff] %v3383_v23 }
  0xd8   : > { %2327 = vmatmul.msk.f32.gmra.mxu3 %vm382_vm2, %v2772_v10 }
  0xd9   : > { %2361 = vmatmul.msk.f32.gmra.mxu0 %vm382_vm2, %v2829_v34  ;;  %v788_v34 = vrot.slane %v2794_v20, 2  ;;  %v790_v20 = vrot.slane %v2841_v38, 2 }
  0xda   : > { %v3378_v51 = vpop.f32.mrf.mxu2 }
  0xdb   : > { %4260 = vst [vmem:[#allocation54_spill] sm:$0xff] %v3378_v51  ;;  %v3380_v56 = vpop.f32.mrf.mxu3  ;;  %v648_v22 = vpop.f32.mrf.mxu1 }
  0xdc   : > { %4261 = vst [vmem:[#allocation55_spill] sm:$0xff] %v3380_v56  ;;  %v649_v51 = vadd.f32 %v648_v22, %v3225_v52  ;;  %v791_v52 = vrot.slane %v2844_v39, 2 }
  0xde   : > { %2260 = vmatmul.msk.f32.gmra.mxu1 %vm382_vm2, %v2767_v7  ;;  %v1227_v0 = vpop.f32.mrf.mxu0  ;;  %v3396_v7 = vsel %vm744_vm3, %v786_v48, %v788_v34 }
  0xdf   : > { %2294 = vmatmul.msk.f32.gmra.mxu2 %vm382_vm2, %v3383_v23 }
  0xe0   : > { %2328 = vmatmul.msk.f32.gmra.mxu3 %vm382_vm2, %v2841_v38 }
  0xe1   : > { %2362 = vmatmul.msk.f32.gmra.mxu0 %vm382_vm2, %v2878_v54 }
  0xe2   : > { %v911_v56 = vpop.f32.mrf.mxu2 }
  0xe3   : > { %v1067_v41 = vpop.f32.mrf.mxu3  ;;  %v1007_v17 = vadd.f32 %v911_v56, %v649_v51  ;;  %v651_v50 = vpop.f32.mrf.mxu1 }
  0xe4   : > { %v652_v34 = vadd.f32 %v651_v50, %v3245_v26  ;;  %v793_v26 = vrot.slane %v2887_v57, 2  ;;  %v795_v57 = vrot.slane %v2926_v9, 2 }
  0xe5   : > { %v1163_v33 = vadd.f32 %v1067_v41, %v1007_v17 }
  0xe6   : > { %2261 = vmatmul.msk.f32.gmra.mxu1 %vm382_vm2, %v2772_v10  ;;  %v1230_v23 = vpop.f32.mrf.mxu0 }
  0xe7   : > { %v3400_v18 = vadd.f32 %v1227_v0, %v1163_v33  ;;  %2295 = vmatmul.msk.f32.gmra.mxu2 %vm382_vm2, %v3396_v7  ;;  %v3412_v0 = vsel %vm744_vm3, %v790_v20, %v791_v52 }
  0xe8   : > { %2329 = vmatmul.msk.f32.gmra.mxu3 %vm382_vm2, %v2844_v39 }
  0xe9   : > { %2363 = vmatmul.msk.f32.gmra.mxu0 %vm382_vm2, %v2914_v2 }
  0xea   : > { %v914_v17 = vpop.f32.mrf.mxu2 }
  0xeb   : > { %v1070_v10 = vpop.f32.mrf.mxu3  ;;  %v1008_v48 = vadd.f32 %v914_v17, %v652_v34  ;;  %v654_v33 = vpop.f32.mrf.mxu1 }
  0xec   : > { %v655_v50 = vadd.f32 %v654_v33, %v3266_v21  ;;  %v796_v21 = vrot.slane %v2929_v11, 2 }
  0xed   : > { %v1164_v51 = vadd.f32 %v1070_v10, %v1008_v48 }
  0xee   : > { %2262 = vmatmul.msk.f32.gmra.mxu1 %vm382_vm2, %v2841_v38  ;;  %v1233_v56 = vpop.f32.mrf.mxu0 }
  0xef   : > { %v3416_v22 = vadd.f32 %v1230_v23, %v1164_v51  ;;  %2296 = vmatmul.msk.f32.gmra.mxu2 %vm382_vm2, %v3412_v0  ;;  %v3427_v23 = vsel %vm744_vm3, %v791_v52, %v793_v26  ;;  %v3443_v26 = vsel %vm744_vm3, %v795_v57, %v796_v21 }
  0xf0   : > { %2330 = vmatmul.msk.f32.gmra.mxu3 %vm382_vm2, %v2926_v9 }
  0xf1   : > { %2364 = vmatmul.msk.f32.gmra.mxu0 %vm382_vm2, %v2969_v49 }
  0xf2   : > { %v917_v41 = vpop.f32.mrf.mxu2 }
  0xf3   : > { %v1073_v20 = vpop.f32.mrf.mxu3  ;;  %v1009_v34 = vadd.f32 %v917_v41, %v655_v50  ;;  %v657_v38 = vpop.f32.mrf.mxu1 }
  0xf4   : > { %v658_v52 = vadd.f32 %v657_v38, %v3286_v30  ;;  %v4264_v30 = vld [vmem:[#allocation24_spill] sm:$0xff] }
  0xf5   : > { %v1165_v17 = vadd.f32 %v1073_v20, %v1009_v34  ;;  %v798_v34 = vrot.slane %v4264_v30, 2 }
  0xf6   : > { %2263 = vmatmul.msk.f32.gmra.mxu1 %vm382_vm2, %v2844_v39  ;;  %v1236_v10 = vpop.f32.mrf.mxu0 }
  0xf7   : > { %v3431_v48 = vadd.f32 %v1233_v56, %v1165_v17  ;;  %2297 = vmatmul.msk.f32.gmra.mxu2 %vm382_vm2, %v3427_v23  ;;  %v4265_v17 = vld [vmem:[#allocation32_spill] sm:$0xff] }
  0xf8   : > { %2331 = vmatmul.msk.f32.gmra.mxu3 %vm382_vm2, %v2929_v11 }
  0xf9   : > { %2365 = vmatmul.msk.f32.gmra.mxu0 %vm382_vm2, %v3014_v58 }
  0xfa   : > { %v920_v33 = vpop.f32.mrf.mxu2 }
  0xfb   : > { %v1076_v39 = vpop.f32.mrf.mxu3  ;;  %v1010_v51 = vadd.f32 %v920_v33, %v658_v52  ;;  %v660_v56 = vpop.f32.mrf.mxu1 }
  0xfc   : > { %v661_v38 = vadd.f32 %v660_v56, %v3307_v36  ;;  %v4267_v36 = vld [vmem:[#allocation28_spill] sm:$0xff]  ;;  %v800_v56 = vrot.slane %v3026_v14, 2 }
  0xfd   : > { %v1166_v50 = vadd.f32 %v1076_v39, %v1010_v51  ;;  %v801_v30 = vrot.slane %v4267_v36, 2 }
  0xfe   : > { %2264 = vmatmul.msk.f32.gmra.mxu1 %vm382_vm2, %v2926_v9  ;;  %v1239_v41 = vpop.f32.mrf.mxu0 }
  0xff   : > { %v3447_v20 = vadd.f32 %v1236_v10, %v1166_v50  ;;  %2298 = vmatmul.msk.f32.gmra.mxu2 %vm382_vm2, %v3443_v26  ;;  %v3458_v10 = vsel %vm744_vm3, %v796_v21, %v798_v34 }
 0x100   : > { %2332 = vmatmul.msk.f32.gmra.mxu3 %vm382_vm2, %v3026_v14 }
 0x101   : > { %4263 = vst [vmem:[#allocation57_spill] sm:$0xff] %v3447_v20  ;;  %2366 = vmatmul.msk.f32.gmra.mxu0 %vm382_vm2, %v4265_v17 }
 0x102   : > { %v923_v57 = vpop.f32.mrf.mxu2 }
 0x103   : > { %v1079_v52 = vpop.f32.mrf.mxu3  ;;  %v1011_v33 = vadd.f32 %v923_v57, %v661_v38  ;;  %v663_v9 = vpop.f32.mrf.mxu1  ;;  %v3474_v57 = vsel %vm744_vm3, %v800_v56, %v801_v30 }
 0x104   : > { %v664_v21 = vadd.f32 %v663_v9, %v3327_v47  ;;  %v4269_v47 = vld [vmem:[#allocation5_spill] sm:$0xff]  ;;  %v4270_v9 = vld [vmem:[#allocation34_spill] sm:$0xff] }
 0x105   : > { %v1167_v39 = vadd.f32 %v1079_v52, %v1011_v33 }
 0x106   : > { %2265 = vmatmul.msk.f32.gmra.mxu1 %vm382_vm2, %v2929_v11  ;;  %v1242_v51 = vpop.f32.mrf.mxu0 }
 0x107   : > { %v3462_v50 = vadd.f32 %v1239_v41, %v1167_v39  ;;  %2299 = vmatmul.msk.f32.gmra.mxu2 %vm382_vm2, %v3458_v10 }
 0x108   : > { %2333 = vmatmul.msk.f32.gmra.mxu3 %vm382_vm2, %v4267_v36 }
 0x109   : > { %4266 = vst [vmem:[#allocation24_spill] sm:$0xff] %v3462_v50  ;;  %2367 = vmatmul.msk.f32.gmra.mxu0 %vm382_vm2, %v3106_v13  ;;  %v803_v50 = vrot.slane %v4270_v9, 2 }
 0x10a   : > { %v926_v34 = vpop.f32.mrf.mxu2 }
 0x10b   : > { %v1082_v11 = vpop.f32.mrf.mxu3  ;;  %v1012_v38 = vadd.f32 %v926_v34, %v664_v21  ;;  %v666_v41 = vpop.f32.mrf.mxu1  ;;  %v4271_v34 = vld [vmem:[#allocation8_spill] sm:$0xff] }
 0x10c   : > { %v667_v21 = vadd.f32 %v666_v41, %v3348_v4  ;;  %v4273_v4 = vld [vmem:[#allocation6_spill] sm:$0xff]  ;;  %v805_v41 = vrot.slane %v4269_v47, 2 }
 0x10d   : > { %v1168_v52 = vadd.f32 %v1082_v11, %v1012_v38  ;;  %v806_v9 = vrot.slane %v4273_v4, 2 }
 0x10e   : > { %2266 = vmatmul.msk.f32.gmra.mxu1 %vm382_vm2, %v3026_v14  ;;  %v1245_v33 = vpop.f32.mrf.mxu0 }
 0x10f   : > { %v3478_v39 = vadd.f32 %v1242_v51, %v1168_v52  ;;  %2300 = vmatmul.msk.f32.gmra.mxu2 %vm382_vm2, %v3474_v57  ;;  %v3489_v51 = vsel %vm744_vm3, %v801_v30, %v803_v50  ;;  %v4274_v30 = vld [vmem:[#allocation12_spill] sm:$0xff] }
 0x110   : > { %2334 = vmatmul.msk.f32.gmra.mxu3 %vm382_vm2, %v4269_v47 }
 0x111   : > { %4268 = vst [vmem:[#allocation32_spill] sm:$0xff] %v3478_v39  ;;  %2368 = vmatmul.msk.f32.gmra.mxu0 %vm382_vm2, %v4271_v34 }
 0x112   : > { %v929_v56 = vpop.f32.mrf.mxu2 }
 0x113   : > { %v1085_v11 = vpop.f32.mrf.mxu3  ;;  %v1013_v38 = vadd.f32 %v929_v56, %v667_v21  ;;  %v669_v14 = vpop.f32.mrf.mxu1 }
 0x114   : > { %v670_v50 = vadd.f32 %v669_v14, %v3368_v35  ;;  %v4277_v35 = vld [vmem:[#allocation13_spill] sm:$0xff] }
 0x115   : > { %v1169_v52 = vadd.f32 %v1085_v11, %v1013_v38  ;;  %v3505_v11 = vsel %vm744_vm3, %v805_v41, %v806_v9  ;;  %v4278_v14 = vld [vmem:[#allocation9_spill] sm:$0xff] }
 0x116   : > { %2267 = vmatmul.msk.f32.gmra.mxu1 %vm382_vm2, %v4267_v36  ;;  %v1248_v39 = vpop.f32.mrf.mxu0  ;;  %4275 = vst [vmem:[#allocation5_spill] sm:$0xff] %v3505_v11 }
 0x117   : > { %v3493_v20 = vadd.f32 %v1245_v33, %v1169_v52  ;;  %2301 = vmatmul.msk.f32.gmra.mxu2 %vm382_vm2, %v3489_v51 }
 0x118   : > { %2335 = vmatmul.msk.f32.gmra.mxu3 %vm382_vm2, %v4273_v4 }
 0x119   : > { %4272 = vst [vmem:[#allocation28_spill] sm:$0xff] %v3493_v20  ;;  %2369 = vmatmul.msk.f32.gmra.mxu0 %vm382_vm2, %v4274_v30  ;;  %v808_v30 = vrot.slane %v4278_v14, 2 }
 0x11a   : > { %v932_v21 = vpop.f32.mrf.mxu2 }
 0x11b   : > { %v1088_v36 = vpop.f32.mrf.mxu3  ;;  %v1014_v56 = vadd.f32 %v932_v21, %v670_v50  ;;  %v672_v33 = vpop.f32.mrf.mxu1  ;;  %v4279_v21 = vld [vmem:[#allocation16_spill] sm:$0xff] }
 0x11c   : > { %v673_v50 = vadd.f32 %v672_v33, %v3218_v31  ;;  %v4281_v31 = vld [vmem:[#allocation14_spill] sm:$0xff]  ;;  %v810_v33 = vrot.slane %v4277_v35, 2 }
 0x11d   : > { %v1170_v38 = vadd.f32 %v1088_v36, %v1014_v56  ;;  %v811_v14 = vrot.slane %v4281_v31, 2 }
 0x11e   : > { %2268 = vmatmul.msk.f32.gmra.mxu1 %vm382_vm2, %v4269_v47  ;;  %v1251_v52 = vpop.f32.mrf.mxu0 }
 0x11f   : > { %v3509_v20 = vadd.f32 %v1248_v39, %v1170_v38  ;;  %2302 = vmatmul.msk.f32.gmra.mxu2 %vm382_vm2, %v3505_v11  ;;  %v3520_v39 = vsel %vm744_vm3, %v806_v9, %v808_v30  ;;  %v4282_v30 = vld [vmem:[#allocation19_spill] sm:$0xff] }
 0x120   : > { %2336 = vmatmul.msk.f32.gmra.mxu3 %vm382_vm2, %v4277_v35 }
 0x121   : > { %4276 = vst [vmem:[#allocation34_spill] sm:$0xff] %v3509_v20  ;;  %2370 = vmatmul.msk.f32.gmra.mxu0 %vm382_vm2, %v4279_v21 }
 0x122   : > { %v935_v41 = vpop.f32.mrf.mxu2 }
 0x123   : > { %v1091_v36 = vpop.f32.mrf.mxu3  ;;  %v1015_v56 = vadd.f32 %v935_v41, %v673_v50  ;;  %v675_v47 = vpop.f32.mrf.mxu1 }
 0x124   : > { %v676_v9 = vadd.f32 %v675_v47, %v3238_v46  ;;  %v4285_v46 = vld [vmem:[#allocation20_spill] sm:$0xff]  ;;  %v4286_v47 = vld [vmem:[#allocation17_spill] sm:$0xff] }
 0x125   : > { %v1171_v38 = vadd.f32 %v1091_v36, %v1015_v56  ;;  %v3536_v36 = vsel %vm744_vm3, %v810_v33, %v811_v14 }
 0x126   : > { %2269 = vmatmul.msk.f32.gmra.mxu1 %vm382_vm2, %v4273_v4  ;;  %v1254_v20 = vpop.f32.mrf.mxu0  ;;  %4283 = vst [vmem:[#allocation6_spill] sm:$0xff] %v3536_v36 }
 0x127   : > { %v3524_v11 = vadd.f32 %v1251_v52, %v1171_v38  ;;  %2303 = vmatmul.msk.f32.gmra.mxu2 %vm382_vm2, %v3520_v39 }
 0x128   : > { %2337 = vmatmul.msk.f32.gmra.mxu3 %vm382_vm2, %v4281_v31 }
 0x129   : > { %4280 = vst [vmem:[#allocation8_spill] sm:$0xff] %v3524_v11  ;;  %2371 = vmatmul.msk.f32.gmra.mxu0 %vm382_vm2, %v4282_v30  ;;  %v813_v30 = vrot.slane %v4286_v47, 2 }
 0x12a   : > { %v938_v50 = vpop.f32.mrf.mxu2 }
 0x12b   : > { %v1094_v4 = vpop.f32.mrf.mxu3  ;;  %v1016_v41 = vadd.f32 %v938_v50, %v676_v9  ;;  %v678_v52 = vpop.f32.mrf.mxu1  ;;  %v4287_v50 = vld [vmem:[#allocation23_spill] sm:$0xff] }
 0x12c   : > { %v679_v9 = vadd.f32 %v678_v52, %v3259_v6  ;;  %v4289_v6 = vld [vmem:[#allocation21_spill] sm:$0xff]  ;;  %v815_v52 = vrot.slane %v4285_v46, 2 }
 0x12d   : > { %v1172_v56 = vadd.f32 %v1094_v4, %v1016_v41  ;;  %v816_v47 = vrot.slane %v4289_v6, 2 }
 0x12e   : > { %2270 = vmatmul.msk.f32.gmra.mxu1 %vm382_vm2, %v4277_v35  ;;  %v1257_v38 = vpop.f32.mrf.mxu0 }
 0x12f   : > { %v3540_v11 = vadd.f32 %v1254_v20, %v1172_v56  ;;  %2304 = vmatmul.msk.f32.gmra.mxu2 %vm382_vm2, %v3536_v36  ;;  %v3551_v20 = vsel %vm744_vm3, %v811_v14, %v813_v30  ;;  %v4290_v30 = vld [vmem:[#allocation27_spill] sm:$0xff] }
 0x130   : > { %2338 = vmatmul.msk.f32.gmra.mxu3 %vm382_vm2, %v4285_v46 }
 0x131   : > { %4284 = vst [vmem:[#allocation13_spill] sm:$0xff] %v3540_v11  ;;  %2372 = vmatmul.msk.f32.gmra.mxu0 %vm382_vm2, %v4287_v50 }
 0x132   : > { %v941_v33 = vpop.f32.mrf.mxu2 }
 0x133   : > { %v1097_v4 = vpop.f32.mrf.mxu3  ;;  %v1017_v41 = vadd.f32 %v941_v33, %v679_v9  ;;  %v681_v35 = vpop.f32.mrf.mxu1 }
 0x134   : > { %v682_v14 = vadd.f32 %v681_v35, %v3279_v1  ;;  %v4293_v1 = vld [vmem:[#allocation29_spill] sm:$0xff] }
 0x135   : > { %v1173_v56 = vadd.f32 %v1097_v4, %v1017_v41  ;;  %v3567_v4 = vsel %vm744_vm3, %v815_v52, %v816_v47  ;;  %v4294_v35 = vld [vmem:[#allocation25_spill] sm:$0xff] }
 0x136   : > { %2271 = vmatmul.msk.f32.gmra.mxu1 %vm382_vm2, %v4281_v31  ;;  %v1260_v11 = vpop.f32.mrf.mxu0  ;;  %4291 = vst [vmem:[#allocation16_spill] sm:$0xff] %v3567_v4  ;;  %v4295_v52 = vld [vmem:[#allocation33_spill] sm:$0xff] }
 0x137   : > { %v3555_v36 = vadd.f32 %v1257_v38, %v1173_v56  ;;  %2305 = vmatmul.msk.f32.gmra.mxu2 %vm382_vm2, %v3551_v20 }
 0x138   : > { %2339 = vmatmul.msk.f32.gmra.mxu3 %vm382_vm2, %v4289_v6 }
 0x139   : > { %4288 = vst [vmem:[#allocation9_spill] sm:$0xff] %v3555_v36  ;;  %2373 = vmatmul.msk.f32.gmra.mxu0 %vm382_vm2, %v4290_v30 }
 0x13a   : > { %v944_v9 = vpop.f32.mrf.mxu2 }
 0x13b   : > { %v1100_v31 = vpop.f32.mrf.mxu3  ;;  %v1018_v33 = vadd.f32 %v944_v9, %v682_v14  ;;  %v684_v38 = vpop.f32.mrf.mxu1  ;;  %v818_v14 = vrot.slane %v4294_v35, 2  ;;  %v820_v35 = vrot.slane %v4293_v1, 2 }
 0x13c   : > { %v685_v9 = vadd.f32 %v684_v38, %v3300_v37  ;;  %v4297_v37 = vld [vmem:[#allocation30_spill] sm:$0xff] }
 0x13d   : > { %v1174_v41 = vadd.f32 %v1100_v31, %v1018_v33  ;;  %v3593_v38 = vld [vmem:[%s2758_s20 + $0x188] sm:$0xff] }
 0x13e   : > { %2272 = vmatmul.msk.f32.gmra.mxu1 %vm382_vm2, %v4285_v46  ;;  %v1263_v56 = vpop.f32.mrf.mxu0 }
 0x13f   : > { %v3571_v36 = vadd.f32 %v1260_v11, %v1174_v41  ;;  %2306 = vmatmul.msk.f32.gmra.mxu2 %vm382_vm2, %v3567_v4  ;;  %v3582_v41 = vsel %vm744_vm3, %v816_v47, %v818_v14  ;;  %v821_v47 = vrot.slane %v4297_v37, 2 }
 0x140   : > { %2340 = vmatmul.msk.f32.gmra.mxu3 %vm382_vm2, %v4293_v1 }
 0x141   : > { %4292 = vst [vmem:[#allocation14_spill] sm:$0xff] %v3571_v36  ;;  %2374 = vmatmul.msk.f32.gmra.mxu0 %vm382_vm2, %v4295_v52 }
 0x142   : > { %v947_v31 = vpop.f32.mrf.mxu2 }
 0x143   : > { %v1103_v46 = vpop.f32.mrf.mxu3  ;;  %v1019_v33 = vadd.f32 %v947_v31, %v685_v9  ;;  %v687_v11 = vpop.f32.mrf.mxu1  ;;  %v3599_v9 = vld [vmem:[%s2758_s20 + $0x180] sm:$0xff]  ;;  %v1197_v31 = vrot.slane %v3593_v38, 1 }
 0x144   : > { %v688_v14 = vadd.f32 %v687_v11, %v3320_v53  ;;  %4298 = vst [vmem:[#allocation17_spill] sm:$0xff] %v3599_v9 }
 0x145   : > { %v1175_v36 = vadd.f32 %v1103_v46, %v1019_v33 }
 0x146   : > { %2273 = vmatmul.msk.f32.gmra.mxu1 %vm382_vm2, %v4289_v6  ;;  %v1266_v30 = vpop.f32.mrf.mxu0 }
 0x147   : > { %v3586_v4 = vadd.f32 %v1263_v56, %v1175_v36  ;;  %2307 = vmatmul.msk.f32.gmra.mxu2 %vm382_vm2, %v3582_v41  ;;  %v1196_v56 = vrot.slane %v3599_v9, 1 }
 0x148   : > { %2341 = vmatmul.msk.f32.gmra.mxu3 %vm382_vm2, %v4297_v37 }
 0x149   : > { %4296 = vst [vmem:[#allocation20_spill] sm:$0xff] %v3586_v4  ;;  %2375 = vmatmul.msk.f32.gmra.mxu0 %vm382_vm2, %v3109_v3  ;;  %v3606_v4 = vsel %vm744_vm3, %v820_v35, %v821_v47  ;;  %v3611_v11 = vsel %vm299_vm1, %v1196_v56, %v1197_v31  ;;  %v823_v35 = vrot.slane %v3082_v15, 2 }
 0x14a   : > { %v950_v36 = vpop.f32.mrf.mxu2 }
 0x14b   : > { %v1106_v6 = vpop.f32.mrf.mxu3  ;;  %v1020_v46 = vadd.f32 %v950_v36, %v688_v14  ;;  %v690_v33 = vpop.f32.mrf.mxu1  ;;  %v3620_v14 = vld [vmem:[%s2758_s20 + $0x190] sm:$0x3] }
 0x14c   : > { %v691_v36 = vadd.f32 %v690_v33, %v3341_v8 }
 0x14d   : > { %v1176_v52 = vadd.f32 %v1106_v6, %v1020_v46  ;;  %v3628_v46 = vsel %vm744_vm3, %v821_v47, %v823_v35 }
 0x14e   : > { %2274 = vmatmul.msk.f32.gmra.mxu1 %vm382_vm2, %v4293_v1  ;;  %v1269_v53 = vpop.f32.mrf.mxu0 }
 0x14f   : > { %v3613_v3 = vadd.f32 %v1266_v30, %v1176_v52  ;;  %2308 = vmatmul.msk.f32.gmra.mxu2 %vm382_vm2, %v3606_v4  ;;  %v1199_v30 = vrot.slane %v3620_v14, 1 }
 0x150   : > { %2342 = vmatmul.msk.f32.gmra.mxu3 %vm382_vm2, %v3599_v9 }
 0x151   : > { %4299 = vst [vmem:[#allocation23_spill] sm:$0xff] %v3613_v3  ;;  %2376 = vmatmul.msk.f32.gmra.mxu0 %vm382_vm2, %v3611_v11  ;;  %v3633_v15 = vsel %vm299_vm1, %v1197_v31, %v1199_v30 }
 0x152   : > { %v953_v1 = vpop.f32.mrf.mxu2 }
 0x153   : > { %v1109_v6 = vpop.f32.mrf.mxu3  ;;  %v1021_v52 = vadd.f32 %v953_v1, %v691_v36  ;;  %v693_v56 = vpop.f32.mrf.mxu1 }
 0x154   : > { %v694_v33 = vadd.f32 %v693_v56, %v3361_v5 }
 0x155   : > { %v1177_v3 = vadd.f32 %v1109_v6, %v1021_v52 }
 0x156   : > { %2275 = vmatmul.msk.f32.gmra.mxu1 %vm382_vm2, %v4297_v37  ;;  %v1272_v9 = vpop.f32.mrf.mxu0 }
 0x157   : > { %v3635_v8 = vadd.f32 %v1269_v53, %v1177_v3  ;;  %2309 = vmatmul.msk.f32.gmra.mxu2 %vm382_vm2, %v3628_v46 }
 0x158   : > { %2343 = vmatmul.msk.f32.gmra.mxu3 %vm382_vm2, %v3593_v38 }
 0x159   : > { %2377 = vmatmul.msk.f32.gmra.mxu0 %vm382_vm2, %v3633_v15 }
 0x15a   : > { %v956_v47 = vpop.f32.mrf.mxu2 }
 0x15b   : > { %v1112_v35 = vpop.f32.mrf.mxu3  ;;  %v1022_v37 = vadd.f32 %v956_v47, %v694_v33  ;;  %v696_v36 = vpop.f32.mrf.mxu1 }
 0x15c   : > { %v697_v5 = vadd.f32 %v696_v36, %v3234_v45 }
 0x15d   : > { %v1178_v1 = vadd.f32 %v1112_v35, %v1022_v37 }
 0x15e   : > { %2380 = vmatmul.msk.f32.vlgmr.msra.gmra.mxu1 %vm382_vm2, %v3144_v28  ;;  %v1275_v3 = vpop.f32.mrf.mxu0 }
 0x15f   : > { %v3646_v31 = vadd.f32 %v1272_v9, %v1178_v1  ;;  %2414 = vmatmul.msk.f32.vlgmr.msra.gmra.mxu2 %vm382_vm2, %v2949_v27 }
 0x160   : > { %2448 = vmatmul.msk.f32.vlgmr.msra.gmra.mxu3 %vm382_vm2, %v2984_v62 }
 0x161   : > { %2482 = vmatmul.msk.f32.vlgmr.msra.gmra.mxu0 %vm382_vm2, %v3169_v61 }
 0x162   : > { %v959_v53 = vpop.f32.mrf.mxu2 }
 0x163   : > { %v1115_v6 = vpop.f32.mrf.mxu3  ;;  %v1023_v30 = vadd.f32 %v959_v53, %v697_v5  ;;  %v699_v52 = vpop.f32.mrf.mxu1 }
 0x164   : > { %v700_v27 = vadd.f32 %v699_v52, %v3255_v43 }
 0x165   : > { %v1179_v56 = vadd.f32 %v1115_v6, %v1023_v30 }
 0x166   : > { %2381 = vmatmul.msk.f32.gmra.mxu1 %vm382_vm2, %v3156_v59  ;;  %v1278_v28 = vpop.f32.mrf.mxu0 }
 0x167   : > { %v3657_v9 = vadd.f32 %v1275_v3, %v1179_v56  ;;  %2415 = vmatmul.msk.f32.gmra.mxu2 %vm382_vm2, %v2952_v29 }
 0x168   : > { %2449 = vmatmul.msk.f32.gmra.mxu3 %vm382_vm2, %v3040_v25 }
 0x169   : > { %2483 = vmatmul.msk.f32.gmra.mxu0 %vm382_vm2, %v3181_v44 }
 0x16a   : > { %v962_v62 = vpop.f32.mrf.mxu2 }
 0x16b   : > { %v1118_v45 = vpop.f32.mrf.mxu3  ;;  %v1024_v33 = vadd.f32 %v962_v62, %v700_v27  ;;  %v702_v47 = vpop.f32.mrf.mxu1 }
 0x16c   : > { %v703_v29 = vadd.f32 %v702_v47, %v3275_v40  ;;  %v2568_v47 = vld [vmem:[%s2758_s20 + $0x68] sm:$0xff] }
 0x16d   : > { %v1180_v35 = vadd.f32 %v1118_v45, %v1024_v33 }
 0x16e   : > { %2382 = vmatmul.msk.f32.gmra.mxu1 %vm382_vm2, %v3169_v61  ;;  %v1281_v59 = vpop.f32.mrf.mxu0 }
 0x16f   : > { %v3668_v37 = vadd.f32 %v1278_v28, %v1180_v35  ;;  %2416 = vmatmul.msk.f32.gmra.mxu2 %vm382_vm2, %v3049_v60 }
 0x170   : > { %2450 = vmatmul.msk.f32.gmra.mxu3 %vm382_vm2, %v3087_v12 }
 0x171   : > { %2484 = vmatmul.msk.f32.gmra.mxu0 %vm382_vm2, %v3194_v63 }
 0x172   : > { %v965_v25 = vpop.f32.mrf.mxu2 }
 0x173   : > { %v1121_v43 = vpop.f32.mrf.mxu3  ;;  %v1025_v36 = vadd.f32 %v965_v25, %v703_v29  ;;  %v705_v1 = vpop.f32.mrf.mxu1 }
 0x174   : > { %v706_v12 = vadd.f32 %v705_v1, %v3296_v16  ;;  %v4300_v16 = vld [vmem:[#allocation37_spill] sm:$0xff] }
 0x175   : > { %v1181_v3 = vadd.f32 %v1121_v43, %v1025_v36 }
 0x176   : > { %2383 = vmatmul.msk.f32.gmra.mxu1 %vm382_vm2, %v3181_v44  ;;  %v1284_v61 = vpop.f32.mrf.mxu0 }
 0x177   : > { %v3679_v5 = vadd.f32 %v1281_v59, %v1181_v3  ;;  %2417 = vmatmul.msk.f32.gmra.mxu2 %vm382_vm2, %v3052_v32  ;;  %v2567_v32 = vld [vmem:[%s2758_s20 + $0x60] sm:$0xff]  ;;  %v4303_v59 = vld [vmem:[#allocation39_spill] sm:$0xff] }
 0x178   : > { %2451 = vmatmul.msk.f32.gmra.mxu3 %vm382_vm2, %v3114_v24 }
 0x179   : > { %2485 = vmatmul.msk.f32.gmra.mxu0 %vm382_vm2, %v3206_v55 }
 0x17a   : > { %v968_v60 = vpop.f32.mrf.mxu2 }
 0x17b   : > { %v1124_v40 = vpop.f32.mrf.mxu3  ;;  %v1026_v53 = vadd.f32 %v968_v60, %v706_v12  ;;  %v708_v6 = vpop.f32.mrf.mxu1  ;;  %v4304_v12 = vld [vmem:[#allocation15_spill] sm:$0xff] }
 0x17c   : > { %v709_v24 = vadd.f32 %v708_v6, %v3316_v42  ;;  %v4302_v42 = vld [vmem:[#allocation48_spill] sm:$0xff]  ;;  %v4305_v60 = vld [vmem:[#allocation51_spill] sm:$0xff] }
 0x17d   : > { %v1182_v30 = vadd.f32 %v1124_v40, %v1026_v53  ;;  %v4306_v53 = vld [vmem:[#allocation41_spill] sm:$0xff] }
 0x17e   : > { %2384 = vmatmul.msk.f32.gmra.mxu1 %vm382_vm2, %v3194_v63  ;;  %v1287_v44 = vpop.f32.mrf.mxu0 }
 0x17f   : > { %v3690_v52 = vadd.f32 %v1284_v61, %v1182_v30  ;;  %2418 = vmatmul.msk.f32.gmra.mxu2 %vm382_vm2, %v2567_v32  ;;  %v2569_v61 = vld [vmem:[%s2758_s20 + $0x78] sm:$0xff] }
 0x180   : > { %2452 = vmatmul.msk.f32.gmra.mxu3 %vm382_vm2, %v2791_v19  ;;  %v4301_v19 = vld [vmem:[#allocation10_spill] sm:$0xff] }
 0x181   : > { %2486 = vmatmul.msk.f32.gmra.mxu0 %vm382_vm2, %v4300_v16 }
 0x182   : > { %v971_v56 = vpop.f32.mrf.mxu2 }
 0x183   : > { %v1127_v28 = vpop.f32.mrf.mxu3  ;;  %v1027_v27 = vadd.f32 %v971_v56, %v709_v24  ;;  %v711_v62 = vpop.f32.mrf.mxu1 }
 0x184   : > { %v712_v35 = vadd.f32 %v711_v62, %v4302_v42  ;;  %v4308_v62 = vld [vmem:[#allocation54_spill] sm:$0xff] }
 0x185   : > { %v1183_v63 = vadd.f32 %v1127_v28, %v1027_v27  ;;  %v2570_v28 = vld [vmem:[%s2758_s20 + $0x80] sm:$0xff]  ;;  %v4307_v27 = vld [vmem:[#allocation18_spill] sm:$0xff] }
 0x186   : > { %2385 = vmatmul.msk.f32.gmra.mxu1 %vm382_vm2, %v3206_v55  ;;  %v1290_v45 = vpop.f32.mrf.mxu0 }
 0x187   : > { %v3701_v33 = vadd.f32 %v1287_v44, %v1183_v63  ;;  %2419 = vmatmul.msk.f32.gmra.mxu2 %vm382_vm2, %v2568_v47 }
 0x188   : > { %2453 = vmatmul.msk.f32.gmra.mxu3 %vm382_vm2, %v4301_v19 }
 0x189   : > { %2487 = vmatmul.msk.f32.gmra.mxu0 %vm382_vm2, %v4303_v59 }
 0x18a   : > { %v974_v29 = vpop.f32.mrf.mxu2 }
 0x18b   : > { %v1130_v25 = vpop.f32.mrf.mxu3  ;;  %v1028_v43 = vadd.f32 %v974_v29, %v712_v35  ;;  %v714_v36 = vpop.f32.mrf.mxu1 }
 0x18c   : > { %v715_v40 = vadd.f32 %v714_v36, %v4305_v60  ;;  %v4310_v36 = vld [vmem:[#allocation22_spill] sm:$0xff] }
 0x18d   : > { %v1184_v55 = vadd.f32 %v1130_v25, %v1028_v43  ;;  %v2571_v43 = vld [vmem:[%s2758_s20 + $0x90] sm:$0xff] }
 0x18e   : > { %2386 = vmatmul.msk.f32.gmra.mxu1 %vm382_vm2, %v4300_v16  ;;  %v1293_v1 = vpop.f32.mrf.mxu0 }
 0x18f   : > { %v3712_v3 = vadd.f32 %v1290_v45, %v1184_v55  ;;  %2420 = vmatmul.msk.f32.gmra.mxu2 %vm382_vm2, %v2569_v61  ;;  %v4309_v45 = vld [vmem:[#allocation43_spill] sm:$0xff]  ;;  %v4311_v55 = vld [vmem:[#allocation38_spill] sm:$0xff]  ;;  %v4312_v61 = vld [vmem:[#allocation45_spill] sm:$0xff] }
 0x190   : > { %2454 = vmatmul.msk.f32.gmra.mxu3 %vm382_vm2, %v4304_v12 }
 0x191   : > { %2488 = vmatmul.msk.f32.gmra.mxu0 %vm382_vm2, %v4306_v53 }
 0x192   : > { %v977_v6 = vpop.f32.mrf.mxu2 }
 0x193   : > { %v1133_v30 = vpop.f32.mrf.mxu3  ;;  %v1029_v44 = vadd.f32 %v977_v6, %v715_v40  ;;  %v717_v32 = vpop.f32.mrf.mxu1 }
 0x194   : > { %v718_v63 = vadd.f32 %v717_v32, %v4308_v62  ;;  %v2572_v32 = vld [vmem:[%s2758_s20 + $0x98] sm:$0xff] }
 0x195   : > { %v1185_v24 = vadd.f32 %v1133_v30, %v1029_v44 }
 0x196   : > { %2387 = vmatmul.msk.f32.gmra.mxu1 %vm382_vm2, %v4303_v59  ;;  %v1296_v16 = vpop.f32.mrf.mxu0 }
 0x197   : > { %v3723_v56 = vadd.f32 %v1293_v1, %v1185_v24  ;;  %2421 = vmatmul.msk.f32.gmra.mxu2 %vm382_vm2, %v2570_v28  ;;  %v4313_v24 = vld [vmem:[#allocation26_spill] sm:$0xff] }
 0x198   : > { %2455 = vmatmul.msk.f32.gmra.mxu3 %vm382_vm2, %v4307_v27  ;;  %v4315_v27 = vld [vmem:[#allocation47_spill] sm:$0xff] }
 0x199   : > { %2489 = vmatmul.msk.f32.gmra.mxu0 %vm382_vm2, %v4309_v45 }
 0x19a   : > { %v980_v47 = vpop.f32.mrf.mxu2 }
 0x19b   : > { %v1136_v19 = vpop.f32.mrf.mxu3  ;;  %v1030_v42 = vadd.f32 %v980_v47, %v718_v63  ;;  %v720_v35 = vpop.f32.mrf.mxu1 }
 0x19c   : > { %v721_v1 = vadd.f32 %v720_v35, %v4311_v55  ;;  %v4318_v55 = vld [vmem:[#allocation50_spill] sm:$0xff] }
 0x19d   : > { %v1186_v59 = vadd.f32 %v1136_v19, %v1030_v42 }
 0x19e   : > { %2388 = vmatmul.msk.f32.gmra.mxu1 %vm382_vm2, %v4306_v53  ;;  %v1299_v29 = vpop.f32.mrf.mxu0 }
 0x19f   : > { %v3734_v25 = vadd.f32 %v1296_v16, %v1186_v59  ;;  %2422 = vmatmul.msk.f32.gmra.mxu2 %vm382_vm2, %v2571_v43  ;;  %v4314_v16 = vld [vmem:[#allocation40_spill] sm:$0xff]  ;;  %v2573_v59 = vld [vmem:[%s2758_s20 + $0xa8] sm:$0xff] }
 0x1a0   : > { %2456 = vmatmul.msk.f32.gmra.mxu3 %vm382_vm2, %v4310_v36  ;;  %v4317_v43 = vld [vmem:[#allocation42_spill] sm:$0xff] }
 0x1a1   : > { %2490 = vmatmul.msk.f32.gmra.mxu0 %vm382_vm2, %v4312_v61 }
 0x1a2   : > { %v983_v12 = vpop.f32.mrf.mxu2 }
 0x1a3   : > { %v1139_v60 = vpop.f32.mrf.mxu3  ;;  %v1031_v40 = vadd.f32 %v983_v12, %v721_v1  ;;  %v723_v6 = vpop.f32.mrf.mxu1 }
 0x1a4   : > { %v724_v28 = vadd.f32 %v723_v6, %v4314_v16 }
 0x1a5   : > { %v1187_v53 = vadd.f32 %v1139_v60, %v1031_v40 }
 0x1a6   : > { %2389 = vmatmul.msk.f32.gmra.mxu1 %vm382_vm2, %v4309_v45  ;;  %v1302_v30 = vpop.f32.mrf.mxu0 }
 0x1a7   : > { %v3745_v44 = vadd.f32 %v1299_v29, %v1187_v53  ;;  %2423 = vmatmul.msk.f32.gmra.mxu2 %vm382_vm2, %v2572_v32  ;;  %v4316_v29 = vld [vmem:[#allocation31_spill] sm:$0xff] }
 0x1a8   : > { %2457 = vmatmul.msk.f32.gmra.mxu3 %vm382_vm2, %v4313_v24  ;;  %v4319_v32 = vld [vmem:[#allocation35_spill] sm:$0xff]  ;;  %v4320_v24 = vld [vmem:[#allocation44_spill] sm:$0xff] }
 0x1a9   : > { %2491 = vmatmul.msk.f32.gmra.mxu0 %vm382_vm2, %v4315_v27 }
 0x1aa   : > { %v986_v62 = vpop.f32.mrf.mxu2 }
 0x1ab   : > { %v1142_v63 = vpop.f32.mrf.mxu3  ;;  %v1032_v47 = vadd.f32 %v986_v62, %v724_v28  ;;  %v726_v19 = vpop.f32.mrf.mxu1  ;;  %v4321_v28 = vld [vmem:[#allocation53_spill] sm:$0xff] }
 0x1ac   : > { %v727_v36 = vadd.f32 %v726_v19, %v4317_v43  ;;  %v4323_v43 = vld [vmem:[#allocation46_spill] sm:$0xff] }
 0x1ad   : > { %v1188_v45 = vadd.f32 %v1142_v63, %v1032_v47 }
 0x1ae   : > { %2390 = vmatmul.msk.f32.gmra.mxu1 %vm382_vm2, %v4312_v61  ;;  %v1305_v42 = vpop.f32.mrf.mxu0 }
 0x1af   : > { %v3756_v35 = vadd.f32 %v1302_v30, %v1188_v45  ;;  %2424 = vmatmul.msk.f32.gmra.mxu2 %vm382_vm2, %v2573_v59  ;;  %v2574_v30 = vld [vmem:[%s2758_s20 + $0xb0] sm:$0xff]  ;;  %v2575_v59 = vld [vmem:[%s2758_s20 + $0xc0] sm:$0xff] }
 0x1b0   : > { %2458 = vmatmul.msk.f32.gmra.mxu3 %vm382_vm2, %v4316_v29  ;;  %v4322_v29 = vld [vmem:[#allocation7_spill] sm:$0xff] }
 0x1b1   : > { %2492 = vmatmul.msk.f32.gmra.mxu0 %vm382_vm2, %v4318_v55 }
 0x1b2   : > { %v989_v1 = vpop.f32.mrf.mxu2 }
 0x1b3   : > { %v1145_v12 = vpop.f32.mrf.mxu3  ;;  %v1033_v60 = vadd.f32 %v989_v1, %v727_v36  ;;  %v729_v40 = vpop.f32.mrf.mxu1  ;;  %v4324_v1 = vld [vmem:[#allocation56_spill] sm:$0xff] }
 0x1b4   : > { %v730_v16 = vadd.f32 %v729_v40, %v4320_v24  ;;  %v4325_v24 = vld [vmem:[#allocation11_spill] sm:$0xff] }
 0x1b5   : > { %v1189_v61 = vadd.f32 %v1145_v12, %v1033_v60 }
 0x1b6   : > { %2391 = vmatmul.msk.f32.gmra.mxu1 %vm382_vm2, %v4315_v27  ;;  %v1308_v6 = vpop.f32.mrf.mxu0 }
 0x1b7   : > { %v3767_v53 = vadd.f32 %v1305_v42, %v1189_v61  ;;  %2425 = vmatmul.msk.f32.gmra.mxu2 %vm382_vm2, %v2574_v30 }
 0x1b8   : > { %2459 = vmatmul.msk.f32.gmra.mxu3 %vm382_vm2, %v4319_v32  ;;  %v2576_v32 = vld [vmem:[%s2758_s20 + $0xc8] sm:$0xff] }
 0x1b9   : > { %2493 = vmatmul.msk.f32.gmra.mxu0 %vm382_vm2, %v4321_v28 }
 0x1ba   : > { %v992_v62 = vpop.f32.mrf.mxu2 }
 0x1bb   : > { %v1148_v63 = vpop.f32.mrf.mxu3  ;;  %v1034_v47 = vadd.f32 %v992_v62, %v730_v16  ;;  %v732_v19 = vpop.f32.mrf.mxu1  ;;  %v4326_v16 = vld [vmem:[#allocation49_spill] sm:$0xff] }
 0x1bc   : > { %v733_v36 = vadd.f32 %v732_v19, %v4323_v43  ;;  %v4327_v43 = vld [vmem:[#allocation52_spill] sm:$0xff] }
 0x1bd   : > { %v1190_v27 = vadd.f32 %v1148_v63, %v1034_v47 }
 0x1be   : > { %2392 = vmatmul.msk.f32.gmra.mxu1 %vm382_vm2, %v4318_v55  ;;  %v1311_v45 = vpop.f32.mrf.mxu0 }
 0x1bf   : > { %v3778_v42 = vadd.f32 %v1308_v6, %v1190_v27  ;;  %2426 = vmatmul.msk.f32.gmra.mxu2 %vm382_vm2, %v2575_v59 }
 0x1c0   : > { %2460 = vmatmul.msk.f32.gmra.mxu3 %vm382_vm2, %v4322_v29  ;;  %v2577_v29 = vld [vmem:[%s2758_s20 + $0xd8] sm:$0xff] }
 0x1c1   : > { %2494 = vmatmul.msk.f32.gmra.mxu0 %vm382_vm2, %v4324_v1 }
 0x1c2   : > { %v995_v12 = vpop.f32.mrf.mxu2 }
 0x1c3   : > { %v1151_v60 = vpop.f32.mrf.mxu3  ;;  %v1035_v40 = vadd.f32 %v995_v12, %v733_v36  ;;  %v735_v61 = vpop.f32.mrf.mxu1 }
 0x1c4   : > { %v736_v62 = vadd.f32 %v735_v61, %v4326_v16 }
 0x1c5   : > { %v1191_v55 = vadd.f32 %v1151_v60, %v1035_v40 }
 0x1c6   : > { %2393 = vmatmul.msk.f32.gmra.mxu1 %vm382_vm2, %v4321_v28  ;;  %v1314_v6 = vpop.f32.mrf.mxu0 }
 0x1c7   : > { %v3789_v30 = vadd.f32 %v1311_v45, %v1191_v55  ;;  %2427 = vmatmul.msk.f32.gmra.mxu2 %vm382_vm2, %v2576_v32  ;;  %v2578_v32 = vld [vmem:[%s2758_s20 + $0xe0] sm:$0xff] }
 0x1c8   : > { %2461 = vmatmul.msk.f32.gmra.mxu3 %vm382_vm2, %v4325_v24 }
 0x1c9   : > { %2495 = vmatmul.msk.f32.gmra.mxu0 %vm382_vm2, %v3396_v7 }
 0x1ca   : > { %v998_v63 = vpop.f32.mrf.mxu2 }
 0x1cb   : > { %v1154_v47 = vpop.f32.mrf.mxu3  ;;  %v1036_v19 = vadd.f32 %v998_v63, %v736_v62  ;;  %v738_v27 = vpop.f32.mrf.mxu1 }
 0x1cc   : > { %v739_v36 = vadd.f32 %v738_v27, %v4327_v43 }
 0x1cd   : > { %v1192_v28 = vadd.f32 %v1154_v47, %v1036_v19 }
 0x1ce   : > { %2394 = vmatmul.msk.f32.gmra.mxu1 %vm382_vm2, %v4324_v1  ;;  %v1317_v45 = vpop.f32.mrf.mxu0 }
 0x1cf   : > { %v3800_v59 = vadd.f32 %v1314_v6, %v1192_v28  ;;  %2428 = vmatmul.msk.f32.gmra.mxu2 %vm382_vm2, %v2577_v29  ;;  %v2579_v28 = vld [vmem:[%s2758_s20 + $0xf0] sm:$0xff] }
 0x1d0   : > { %2462 = vmatmul.msk.f32.gmra.mxu3 %vm382_vm2, %v2878_v54  ;;  %v4328_v54 = vld [vmem:[#allocation55_spill] sm:$0xff] }
 0x1d1   : > { %2496 = vmatmul.msk.f32.gmra.mxu0 %vm382_vm2, %v3412_v0 }
 0x1d2   : > { %v1001_v12 = vpop.f32.mrf.mxu2 }
 0x1d3   : > { %v1157_v60 = vpop.f32.mrf.mxu3  ;;  %v1037_v40 = vadd.f32 %v1001_v12, %v739_v36  ;;  %v741_v61 = vpop.f32.mrf.mxu1  ;;  %v3834_v12 = vld [vmem:[%s4131_s2] ss:$0 sm:$0xff] }
 0x1d4   : > { %v742_v24 = vadd.f32 %v741_v61, %v4328_v54 }
 0x1d5   : > { %v1193_v1 = vadd.f32 %v1157_v60, %v1037_v40  ;;  %v3842_v60 = vld [vmem:[%s4132_s3] ss:$0 sm:$0xff]  ;;  %v2580_v40 = vld [vmem:[%s2758_s20 + $0xf8] sm:$0xff] }
 0x1d6   : > { %2395 = vmatmul.msk.f32.gmra.mxu1 %vm382_vm2, %v3396_v7  ;;  %v1320_v55 = vpop.f32.mrf.mxu0 }
 0x1d7   : > { %v3811_v6 = vadd.f32 %v1317_v45, %v1193_v1  ;;  %2429 = vmatmul.msk.f32.gmra.mxu2 %vm382_vm2, %v2578_v32 }
 0x1d8   : > { %2463 = vmatmul.msk.f32.gmra.mxu3 %vm382_vm2, %v2914_v2 }
 0x1d9   : > { %2497 = vmatmul.msk.f32.gmra.mxu0 %vm382_vm2, %v3427_v23 }
 0x1da   : > { %v1004_v16 = vpop.f32.mrf.mxu2 }
 0x1db   : > { %v1160_v62 = vpop.f32.mrf.mxu3  ;;  %v1038_v63 = vadd.f32 %v1004_v16, %v742_v24  ;;  %v1386_v47 = vpop.f32.mrf.mxu1 }
 0x1dc   : > { %v1482_v2 = vadd.f32 %v1386_v47, %v3400_v18 }
 0x1dd   : > { %v1194_v7 = vadd.f32 %v1160_v62, %v1038_v63  ;;  %v2581_v63 = vld [vmem:[%s2758_s20 + $0x108] sm:$0xff] }
 0x1de   : > { %2396 = vmatmul.msk.f32.gmra.mxu1 %vm382_vm2, %v3412_v0  ;;  %v1861_v19 = vpop.f32.mrf.mxu0 }
 0x1df   : > { %v3822_v27 = vadd.f32 %v1320_v55, %v1194_v7  ;;  %2430 = vmatmul.msk.f32.gmra.mxu2 %vm382_vm2, %v2579_v28 }
 0x1e0   : > { %2464 = vmatmul.msk.f32.gmra.mxu3 %vm382_vm2, %v2969_v49 }
 0x1e1   : > { %2498 = vmatmul.msk.f32.gmra.mxu0 %vm382_vm2, %v3443_v26 }
 0x1e2   : > { %v1542_v45 = vpop.f32.mrf.mxu2 }
 0x1e3   : > { %v1702_v29 = vpop.f32.mrf.mxu3  ;;  %v1638_v43 = vadd.f32 %v1542_v45, %v1482_v2  ;;  %v1389_v0 = vpop.f32.mrf.mxu1 }
 0x1e4   : > { %v1483_v61 = vadd.f32 %v1389_v0, %v3416_v22 }
 0x1e5   : > { %v1798_v36 = vadd.f32 %v1702_v29, %v1638_v43 }
 0x1e6   : > { %2397 = vmatmul.msk.f32.gmra.mxu1 %vm382_vm2, %v3427_v23  ;;  %v1864_v49 = vpop.f32.mrf.mxu0 }
 0x1e7   : > { %v1957_v18 = vadd.f32 %v1861_v19, %v1798_v36  ;;  %2431 = vmatmul.msk.f32.gmra.mxu2 %vm382_vm2, %v2580_v40  ;;  %v4329_v36 = vld [vmem:[#allocation57_spill] sm:$0xff] }
 0x1e8   : > { %2465 = vmatmul.msk.f32.gmra.mxu3 %vm382_vm2, %v3014_v58 }
 0x1e9   : > { %v1993_v23 = vmul.f32 %v3834_v12, %v1957_v18  ;;  %2499 = vmatmul.msk.f32.gmra.mxu0 %vm382_vm2, %v3458_v10 }
 0x1ea   : > { %v1545_v1 = vpop.f32.mrf.mxu2 }
 0x1eb   : > { %v1705_v55 = vpop.f32.mrf.mxu3  ;;  %v2029_v32 = vadd.f32 %v3842_v60, %v1993_v23  ;;  %v1639_v54 = vadd.f32 %v1545_v1, %v1483_v61  ;;  %v1392_v24 = vpop.f32.mrf.mxu1 }
 0x1ec   : > { %v1484_v47 = vadd.f32 %v1392_v24, %v3431_v48  ;;  %v2582_v48 = vld [vmem:[%s2758_s20 + $0x110] sm:$0xff]  ;;  %v2583_v24 = vld [vmem:[%s2758_s20 + $0x120] sm:$0xff] }
 0x1ed   : > { %v2061_v16 = vmax.f32 %v2029_v32, 0.0  ;;  %v1799_v62 = vadd.f32 %v1705_v55, %v1639_v54 }
 0x1ee   : > { %2398 = vmatmul.msk.f32.gmra.mxu1 %vm382_vm2, %v3443_v26  ;;  %v1867_v58 = vpop.f32.mrf.mxu0 }
 0x1ef   : > { %2093 = vst [vmem:[%s3857_s13] sm:$0xff] %v2061_v16  ;;  %v1958_v22 = vadd.f32 %v1864_v49, %v1799_v62  ;;  %2432 = vmatmul.msk.f32.gmra.mxu2 %vm382_vm2, %v2581_v63  ;;  %v4330_v16 = vld [vmem:[#allocation24_spill] sm:$0xff] }
 0x1f0   : > { %2466 = vmatmul.msk.f32.gmra.mxu3 %vm382_vm2, %v4265_v17 }
 0x1f1   : > { %v1994_v7 = vmul.f32 %v3834_v12, %v1958_v22  ;;  %2500 = vmatmul.msk.f32.gmra.mxu0 %vm382_vm2, %v3474_v57  ;;  %v4331_v22 = vld [vmem:[#allocation5_spill] sm:$0xff] }
 0x1f2   : > { %v1548_v26 = vpop.f32.mrf.mxu2 }
 0x1f3   : > { %v1708_v19 = vpop.f32.mrf.mxu3  ;;  %v2030_v28 = vadd.f32 %v3842_v60, %v1994_v7  ;;  %v1640_v2 = vadd.f32 %v1548_v26, %v1484_v47  ;;  %v1395_v45 = vpop.f32.mrf.mxu1 }
 0x1f4   : > { %v1485_v49 = vadd.f32 %v1395_v45, %v4329_v36  ;;  %v2584_v45 = vld [vmem:[%s2758_s20 + $0x128] sm:$0xff] }
 0x1f5   : > { %v2062_v29 = vmax.f32 %v2030_v28, 0.0  ;;  %v1800_v43 = vadd.f32 %v1708_v19, %v1640_v2 }
 0x1f6   : > { %2399 = vmatmul.msk.f32.gmra.mxu1 %vm382_vm2, %v3458_v10  ;;  %v1870_v0 = vpop.f32.mrf.mxu0 }
 0x1f7   : > { %2094 = vst [vmem:[%s3857_s13 + $0x8] sm:$0xff] %v2062_v29  ;;  %v1959_v17 = vadd.f32 %v1867_v58, %v1800_v43  ;;  %2433 = vmatmul.msk.f32.gmra.mxu2 %vm382_vm2, %v2582_v48  ;;  %v4332_v29 = vld [vmem:[#allocation12_spill] sm:$0xff] }
 0x1f8   : > { %2467 = vmatmul.msk.f32.gmra.mxu3 %vm382_vm2, %v3106_v13  ;;  %v4333_v43 = vld [vmem:[#allocation32_spill] sm:$0xff] }
 0x1f9   : > { %v1995_v18 = vmul.f32 %v3834_v12, %v1959_v17  ;;  %2501 = vmatmul.msk.f32.gmra.mxu0 %vm382_vm2, %v3489_v51 }
 0x1fa   : > { %v1551_v40 = vpop.f32.mrf.mxu2 }
 0x1fb   : > { %v1711_v10 = vpop.f32.mrf.mxu3  ;;  %v2031_v61 = vadd.f32 %v3842_v60, %v1995_v18  ;;  %v1641_v23 = vadd.f32 %v1551_v40, %v1485_v49  ;;  %v1398_v1 = vpop.f32.mrf.mxu1 }
 0x1fc   : > { %v1486_v62 = vadd.f32 %v1398_v1, %v4330_v16  ;;  %v2585_v1 = vld [vmem:[%s2758_s20 + $0x138] sm:$0xff] }
 0x1fd   : > { %v2063_v55 = vmax.f32 %v2031_v61, 0.0  ;;  %v1801_v32 = vadd.f32 %v1711_v10, %v1641_v23 }
 0x1fe   : > { %2400 = vmatmul.msk.f32.gmra.mxu1 %vm382_vm2, %v3474_v57  ;;  %v1873_v54 = vpop.f32.mrf.mxu0 }
 0x1ff   : > { %2095 = vst [vmem:[%s3857_s13 + $0x10] sm:$0xff] %v2063_v55  ;;  %v1960_v13 = vadd.f32 %v1870_v0, %v1801_v32  ;;  %2434 = vmatmul.msk.f32.gmra.mxu2 %vm382_vm2, %v2583_v24  ;;  %v4334_v55 = vld [vmem:[#allocation28_spill] sm:$0xff] }
 0x200   : > { %2468 = vmatmul.msk.f32.gmra.mxu3 %vm382_vm2, %v4271_v34 }
 0x201   : > { %v1996_v58 = vmul.f32 %v3834_v12, %v1960_v13  ;;  %2502 = vmatmul.msk.f32.gmra.mxu0 %vm382_vm2, %v4331_v22  ;;  %v4335_v13 = vld [vmem:[#allocation6_spill] sm:$0xff] }
 0x202   : > { %v1554_v63 = vpop.f32.mrf.mxu2 }
 0x203   : > { %v1714_v57 = vpop.f32.mrf.mxu3  ;;  %v2032_v47 = vadd.f32 %v3842_v60, %v1996_v58  ;;  %v1642_v7 = vadd.f32 %v1554_v63, %v1486_v62  ;;  %v1401_v26 = vpop.f32.mrf.mxu1 }
 0x204   : > { %v1487_v0 = vadd.f32 %v1401_v26, %v4333_v43  ;;  %v4336_v26 = vld [vmem:[#allocation19_spill] sm:$0xff] }
 0x205   : > { %v2064_v19 = vmax.f32 %v2032_v47, 0.0  ;;  %v1802_v28 = vadd.f32 %v1714_v57, %v1642_v7  ;;  %v2586_v7 = vld [vmem:[%s2758_s20 + $0x140] sm:$0xff] }
 0x206   : > { %2401 = vmatmul.msk.f32.gmra.mxu1 %vm382_vm2, %v3489_v51  ;;  %v1876_v2 = vpop.f32.mrf.mxu0 }
 0x207   : > { %2096 = vst [vmem:[%s3857_s13 + $0x18] sm:$0xff] %v2064_v19  ;;  %v1961_v34 = vadd.f32 %v1873_v54, %v1802_v28  ;;  %2435 = vmatmul.msk.f32.gmra.mxu2 %vm382_vm2, %v2584_v45  ;;  %v4337_v19 = vld [vmem:[#allocation34_spill] sm:$0xff] }
 0x208   : > { %2469 = vmatmul.msk.f32.gmra.mxu3 %vm382_vm2, %v4332_v29 }
 0x209   : > { %v1997_v17 = vmul.f32 %v3834_v12, %v1961_v34  ;;  %2503 = vmatmul.msk.f32.gmra.mxu0 %vm382_vm2, %v3520_v39 }
 0x20a   : > { %v1557_v48 = vpop.f32.mrf.mxu2 }
 0x20b   : > { %v1717_v51 = vpop.f32.mrf.mxu3  ;;  %v2033_v36 = vadd.f32 %v3842_v60, %v1997_v17  ;;  %v1643_v49 = vadd.f32 %v1557_v48, %v1487_v0  ;;  %v1404_v18 = vpop.f32.mrf.mxu1 }
 0x20c   : > { %v1488_v32 = vadd.f32 %v1404_v18, %v4334_v55 }
 0x20d   : > { %v2065_v40 = vmax.f32 %v2033_v36, 0.0  ;;  %v1803_v10 = vadd.f32 %v1717_v51, %v1643_v49  ;;  %v2587_v36 = vld [vmem:[%s2758_s20 + $0x150] sm:$0xff]  ;;  %v4338_v49 = vld [vmem:[#allocation8_spill] sm:$0xff] }
 0x20e   : > { %2402 = vmatmul.msk.f32.gmra.mxu1 %vm382_vm2, %v4331_v22  ;;  %v1879_v61 = vpop.f32.mrf.mxu0 }
 0x20f   : > { %2097 = vst [vmem:[%s3857_s13 + $0x20] sm:$0xff] %v2065_v40  ;;  %v1962_v23 = vadd.f32 %v1876_v2, %v1803_v10  ;;  %2436 = vmatmul.msk.f32.gmra.mxu2 %vm382_vm2, %v2585_v1  ;;  %v4339_v10 = vld [vmem:[#allocation16_spill] sm:$0xff] }
 0x210   : > { %2470 = vmatmul.msk.f32.gmra.mxu3 %vm382_vm2, %v4279_v21 }
 0x211   : > { %v1998_v54 = vmul.f32 %v3834_v12, %v1962_v23  ;;  %2504 = vmatmul.msk.f32.gmra.mxu0 %vm382_vm2, %v4335_v13 }
 0x212   : > { %v1560_v24 = vpop.f32.mrf.mxu2 }
 0x213   : > { %v1720_v16 = vpop.f32.mrf.mxu3  ;;  %v2034_v62 = vadd.f32 %v3842_v60, %v1998_v54  ;;  %v1644_v58 = vadd.f32 %v1560_v24, %v1488_v32  ;;  %v1407_v22 = vpop.f32.mrf.mxu1 }
 0x214   : > { %v1489_v28 = vadd.f32 %v1407_v22, %v4337_v19 }
 0x215   : > { %v2066_v63 = vmax.f32 %v2034_v62, 0.0  ;;  %v1804_v57 = vadd.f32 %v1720_v16, %v1644_v58  ;;  %v2588_v16 = vld [vmem:[%s2758_s20 + $0x158] sm:$0xff]  ;;  %v4340_v62 = vld [vmem:[#allocation27_spill] sm:$0xff]  ;;  %v4341_v58 = vld [vmem:[#allocation13_spill] sm:$0xff] }
 0x216   : > { %2403 = vmatmul.msk.f32.gmra.mxu1 %vm382_vm2, %v3520_v39  ;;  %v1882_v47 = vpop.f32.mrf.mxu0 }
 0x217   : > { %2098 = vst [vmem:[%s3857_s13 + $0x28] sm:$0xff] %v2066_v63  ;;  %v1963_v21 = vadd.f32 %v1879_v61, %v1804_v57  ;;  %2437 = vmatmul.msk.f32.gmra.mxu2 %vm382_vm2, %v2586_v7 }
 0x218   : > { %2471 = vmatmul.msk.f32.gmra.mxu3 %vm382_vm2, %v4336_v26 }
 0x219   : > { %v1999_v2 = vmul.f32 %v3834_v12, %v1963_v21  ;;  %2505 = vmatmul.msk.f32.gmra.mxu0 %vm382_vm2, %v3551_v20 }
 0x21a   : > { %v1563_v34 = vpop.f32.mrf.mxu2 }
 0x21b   : > { %v1723_v39 = vpop.f32.mrf.mxu3  ;;  %v2035_v45 = vadd.f32 %v3842_v60, %v1999_v2  ;;  %v1645_v29 = vadd.f32 %v1563_v34, %v1489_v28  ;;  %v1410_v43 = vpop.f32.mrf.mxu1  ;;  %v2589_v34 = vld [vmem:[%s2758_s20 + $0x168] sm:$0xff] }
 0x21c   : > { %v1490_v18 = vadd.f32 %v1410_v43, %v4338_v49 }
 0x21d   : > { %v2067_v0 = vmax.f32 %v2035_v45, 0.0  ;;  %v1805_v17 = vadd.f32 %v1723_v39, %v1645_v29  ;;  %v4342_v39 = vld [vmem:[#allocation33_spill] sm:$0xff] }
 0x21e   : > { %2404 = vmatmul.msk.f32.gmra.mxu1 %vm382_vm2, %v4335_v13  ;;  %v1885_v48 = vpop.f32.mrf.mxu0  ;;  %v4343_v45 = vld [vmem:[#allocation9_spill] sm:$0xff] }
 0x21f   : > { %2099 = vst [vmem:[%s3857_s13 + $0x30] sm:$0xff] %v2067_v0  ;;  %v1964_v51 = vadd.f32 %v1882_v47, %v1805_v17  ;;  %2438 = vmatmul.msk.f32.gmra.mxu2 %vm382_vm2, %v2587_v36 }
 0x220   : > { %2472 = vmatmul.msk.f32.gmra.mxu3 %vm382_vm2, %v4287_v50 }
 0x221   : > { %v2000_v40 = vmul.f32 %v3834_v12, %v1964_v51  ;;  %2506 = vmatmul.msk.f32.gmra.mxu0 %vm382_vm2, %v4339_v10 }
 0x222   : > { %v1566_v61 = vpop.f32.mrf.mxu2 }
 0x223   : > { %v1726_v23 = vpop.f32.mrf.mxu3  ;;  %v2036_v1 = vadd.f32 %v3842_v60, %v2000_v40  ;;  %v1646_v55 = vadd.f32 %v1566_v61, %v1490_v18  ;;  %v1413_v32 = vpop.f32.mrf.mxu1  ;;  %v2590_v61 = vld [vmem:[%s2758_s20 + $0x170] sm:$0xff] }
 0x224   : > { %v1491_v22 = vadd.f32 %v1413_v32, %v4341_v58 }
 0x225   : > { %v2068_v54 = vmax.f32 %v2036_v1, 0.0  ;;  %v1806_v13 = vadd.f32 %v1726_v23, %v1646_v55  ;;  %v4344_v23 = vld [vmem:[#allocation36_spill] sm:$0xff]  ;;  %v4345_v1 = vld [vmem:[#allocation14_spill] sm:$0xff] }
 0x226   : > { %2405 = vmatmul.msk.f32.gmra.mxu1 %vm382_vm2, %v3551_v20  ;;  %v1888_v24 = vpop.f32.mrf.mxu0 }
 0x227   : > { %2100 = vst [vmem:[%s3857_s13 + $0x38] sm:$0xff] %v2068_v54  ;;  %v1965_v50 = vadd.f32 %v1885_v48, %v1806_v13  ;;  %2439 = vmatmul.msk.f32.gmra.mxu2 %vm382_vm2, %v2588_v16  ;;  %v4346_v54 = vld [vmem:[#allocation17_spill] sm:$0xff] }
 0x228   : > { %2473 = vmatmul.msk.f32.gmra.mxu3 %vm382_vm2, %v4340_v62  ;;  %v1355_v13 = vrot.slane %v4346_v54, 2 }
 0x229   : > { %v2001_v63 = vmul.f32 %v3834_v12, %v1965_v50  ;;  %2507 = vmatmul.msk.f32.gmra.mxu0 %vm382_vm2, %v3582_v41 }
 0x22a   : > { %v1569_v57 = vpop.f32.mrf.mxu2 }
 0x22b   : > { %v1729_v20 = vpop.f32.mrf.mxu3  ;;  %v2037_v47 = vadd.f32 %v3842_v60, %v2001_v63  ;;  %v1647_v21 = vadd.f32 %v1569_v57, %v1491_v22  ;;  %v1416_v7 = vpop.f32.mrf.mxu1 }
 0x22c   : > { %v1492_v29 = vadd.f32 %v1416_v7, %v4343_v45 }
 0x22d   : > { %v2069_v26 = vmax.f32 %v2037_v47, 0.0  ;;  %v1807_v19 = vadd.f32 %v1729_v20, %v1647_v21  ;;  %v4347_v21 = vld [vmem:[#allocation20_spill] sm:$0xff] }
 0x22e   : > { %2406 = vmatmul.msk.f32.gmra.mxu1 %vm382_vm2, %v4339_v10  ;;  %v1891_v28 = vpop.f32.mrf.mxu0 }
 0x22f   : > { %2101 = vst [vmem:[%s3857_s13 + $0x40] sm:$0xff] %v2069_v26  ;;  %v1966_v2 = vadd.f32 %v1888_v24, %v1807_v19  ;;  %2440 = vmatmul.msk.f32.gmra.mxu2 %vm382_vm2, %v2589_v34 }
 0x230   : > { %2474 = vmatmul.msk.f32.gmra.mxu3 %vm382_vm2, %v4342_v39 }
 0x231   : > { %v2002_v43 = vmul.f32 %v3834_v12, %v1966_v2  ;;  %2508 = vmatmul.msk.f32.gmra.mxu0 %vm382_vm2, %v3606_v4 }
 0x232   : > { %v1572_v0 = vpop.f32.mrf.mxu2 }
 0x233   : > { %v1732_v17 = vpop.f32.mrf.mxu3  ;;  %v2038_v48 = vadd.f32 %v3842_v60, %v2002_v43  ;;  %v1648_v51 = vadd.f32 %v1572_v0, %v1492_v29  ;;  %v1419_v36 = vpop.f32.mrf.mxu1  ;;  %v247_v43 = vld [vmem:[%s2758_s20 + $0x198] sm:$0xff]  ;;  %v248_v0 = vld [vmem:[%s2758_s20 + $0x1a0] sm:$0xff] }
 0x234   : > { %v1493_v55 = vadd.f32 %v1419_v36, %v4345_v1  ;;  %v4348_v36 = vld [vmem:[#allocation23_spill] sm:$0xff] }
 0x235   : > { %v2070_v49 = vmax.f32 %v2038_v48, 0.0  ;;  %v1808_v18 = vadd.f32 %v1732_v17, %v1648_v51  ;;  %v1672_v51 = vrot.slane %v248_v0, 1 }
 0x236   : > { %2407 = vmatmul.msk.f32.gmra.mxu1 %vm382_vm2, %v3582_v41  ;;  %v1894_v40 = vpop.f32.mrf.mxu0  ;;  %v1356_v41 = vrot.slane %v3593_v38, 2 }
 0x237   : > { %2102 = vst [vmem:[%s3857_s13 + $0x48] sm:$0xff] %v2070_v49  ;;  %v1967_v10 = vadd.f32 %v1891_v28, %v1808_v18  ;;  %2441 = vmatmul.msk.f32.gmra.mxu2 %vm382_vm2, %v2590_v61  ;;  %v1358_v28 = vrot.slane %v3620_v14, 2  ;;  %v1671_v14 = vrot.slane %v247_v43, 1  ;;  %v1831_v61 = vrot.slane %v248_v0, 2 }
 0x238   : > { %2475 = vmatmul.msk.f32.gmra.mxu3 %vm382_vm2, %v4344_v23  ;;  %v1357_v20 = vsel %vm744_vm3, %v1355_v13, %v1356_v41 }
 0x239   : > { %v2003_v32 = vmul.f32 %v3834_v12, %v1967_v10  ;;  %2509 = vmatmul.msk.f32.gmra.mxu0 %vm382_vm2, %v3628_v46  ;;  %v1359_v17 = vsel %vm744_vm3, %v1356_v41, %v1358_v28  ;;  %v1830_v10 = vrot.slane %v247_v43, 2 }
 0x23a   : > { %v1575_v24 = vpop.f32.mrf.mxu2 }
 0x23b   : > { %v1735_v50 = vpop.f32.mrf.mxu3  ;;  %v2039_v16 = vadd.f32 %v3842_v60, %v2003_v32  ;;  %v1649_v62 = vadd.f32 %v1575_v24, %v1493_v55  ;;  %v1422_v58 = vpop.f32.mrf.mxu1  ;;  %v1832_v41 = vsel %vm744_vm3, %v1830_v10, %v1831_v61 }
 0x23c   : > { %v1494_v7 = vadd.f32 %v1422_v58, %v4347_v21 }
 0x23d   : > { %v2071_v22 = vmax.f32 %v2039_v16, 0.0  ;;  %v1809_v63 = vadd.f32 %v1735_v50, %v1649_v62 }
 0x23e   : > { %2408 = vmatmul.msk.f32.gmra.mxu1 %vm382_vm2, %v3606_v4  ;;  %v1897_v57 = vpop.f32.mrf.mxu0 }
 0x23f   : > { %2103 = vst [vmem:[%s3857_s13 + $0x50] sm:$0xff] %v2071_v22  ;;  %v1968_v47 = vadd.f32 %v1894_v40, %v1809_v63  ;;  %2442 = vmatmul.msk.f32.gmra.mxu2 %vm382_vm2, %v4346_v54  ;;  %v249_v54 = vld [vmem:[%s2758_s20 + $0x1a8] sm:$0x3] }
 0x240   : > { %2476 = vmatmul.msk.f32.gmra.mxu3 %vm382_vm2, %v3611_v11  ;;  %v1674_v50 = vrot.slane %v249_v54, 1  ;;  %v1833_v63 = vrot.slane %v249_v54, 2 }
 0x241   : > { %v2004_v26 = vmul.f32 %v3834_v12, %v1968_v47  ;;  %2510 = vmatmul.msk.f32.gmra.mxu0 %vm382_vm2, %v1357_v20 }
 0x242   : > { %v1578_v4 = vpop.f32.mrf.mxu2  ;;  %v1675_v21 = vsel %vm299_vm1, %v1672_v51, %v1674_v50 }
 0x243   : > { %v1738_v19 = vpop.f32.mrf.mxu3  ;;  %v2040_v2 = vadd.f32 %v3842_v60, %v2004_v26  ;;  %v1650_v34 = vadd.f32 %v1578_v4, %v1494_v7  ;;  %v1425_v39 = vpop.f32.mrf.mxu1 }
 0x244   : > { %v1495_v49 = vadd.f32 %v1425_v39, %v4348_v36 }
 0x245   : > { %v2072_v45 = vmax.f32 %v2040_v2, 0.0  ;;  %v1810_v29 = vadd.f32 %v1738_v19, %v1650_v34 }
 0x246   : > { %2409 = vmatmul.msk.f32.gmra.mxu1 %vm382_vm2, %v3628_v46  ;;  %v1900_v11 = vpop.f32.mrf.mxu0 }
 0x247   : > { %2104 = vst [vmem:[%s3857_s13 + $0x58] sm:$0xff] %v2072_v45  ;;  %v1969_v48 = vadd.f32 %v1897_v57, %v1810_v29  ;;  %2443 = vmatmul.msk.f32.gmra.mxu2 %vm382_vm2, %v3593_v38 }
 0x248   : > { %2477 = vmatmul.msk.f32.gmra.mxu3 %vm382_vm2, %v3633_v15  ;;  %v1673_v15 = vsel %vm299_vm1, %v1671_v14, %v1672_v51 }
 0x249   : > { %v2005_v18 = vmul.f32 %v3834_v12, %v1969_v48  ;;  %2511 = vmatmul.msk.f32.gmra.mxu0 %vm382_vm2, %v1359_v17 }
 0x24a   : > { %v1581_v46 = vpop.f32.mrf.mxu2 }
 0x24b   : > { %v1741_v40 = vpop.f32.mrf.mxu3  ;;  %v2041_v23 = vadd.f32 %v3842_v60, %v2005_v18  ;;  %v1651_v38 = vadd.f32 %v1581_v46, %v1495_v49  ;;  %v1428_v1 = vpop.f32.mrf.mxu1 }
 0x24c   : > { %v1496_v16 = vadd.f32 %v1428_v1, %v3635_v8  ;;  %v1834_v8 = vsel %vm744_vm3, %v1831_v61, %v1833_v63 }
 0x24d   : > { %v2073_v55 = vmax.f32 %v2041_v23, 0.0  ;;  %v1811_v32 = vadd.f32 %v1741_v40, %v1651_v38 }
 0x24e   : > { %2410 = vmatmul.msk.f32.gmra.mxu1 %vm382_vm2, %v1357_v20  ;;  %v1903_v13 = vpop.f32.mrf.mxu0 }
 0x24f   : > { %2105 = vst [vmem:[%s3857_s13 + $0x60] sm:$0xff] %v2073_v55  ;;  %v1970_v24 = vadd.f32 %v1900_v11, %v1811_v32  ;;  %2444 = vmatmul.msk.f32.gmra.mxu2 %vm382_vm2, %v247_v43 }
 0x250   : > { %2478 = vmatmul.msk.f32.gmra.mxu3 %vm382_vm2, %v1673_v15 }
 0x251   : > { %v2006_v62 = vmul.f32 %v3834_v12, %v1970_v24  ;;  %2512 = vmatmul.msk.f32.gmra.mxu0 %vm382_vm2, %v1832_v41 }
 0x252   : > { %v1584_v58 = vpop.f32.mrf.mxu2 }
 0x253   : > { %v1744_v22 = vpop.f32.mrf.mxu3  ;;  %v2042_v57 = vadd.f32 %v3842_v60, %v2006_v62  ;;  %v1652_v20 = vadd.f32 %v1584_v58, %v1496_v16  ;;  %v1431_v47 = vpop.f32.mrf.mxu1 }
 0x254   : > { %v1497_v28 = vadd.f32 %v1431_v47, %v3646_v31 }
 0x255   : > { %v2074_v7 = vmax.f32 %v2042_v57, 0.0  ;;  %v1812_v26 = vadd.f32 %v1744_v22, %v1652_v20 }
 0x256   : > { %2411 = vmatmul.msk.f32.gmra.mxu1 %vm382_vm2, %v1359_v17  ;;  %v1906_v4 = vpop.f32.mrf.mxu0 }
 0x257   : > { %2106 = vst [vmem:[%s3857_s13 + $0x68] sm:$0xff] %v2074_v7  ;;  %v1971_v19 = vadd.f32 %v1903_v13, %v1812_v26  ;;  %2445 = vmatmul.msk.f32.gmra.mxu2 %vm382_vm2, %v248_v0 }
 0x258   : > { %2479 = vmatmul.msk.f32.gmra.mxu3 %vm382_vm2, %v1675_v21 }
 0x259   : > { %v2007_v2 = vmul.f32 %v3834_v12, %v1971_v19  ;;  %2513 = vmatmul.msk.f32.gmra.mxu0 %vm382_vm2, %v1834_v8 }
 0x25a   : > { %v1587_v34 = vpop.f32.mrf.mxu2 }
 0x25b   : > { %v1747_v39 = vpop.f32.mrf.mxu3  ;;  %v2043_v45 = vadd.f32 %v3842_v60, %v2007_v2  ;;  %v1653_v29 = vadd.f32 %v1587_v34, %v1497_v28  ;;  %v1434_v43 = vpop.f32.mrf.mxu1 }
 0x25c   : > { %v1498_v14 = vadd.f32 %v1434_v43, %v3657_v9 }
 0x25d   : > { %v2075_v11 = vmax.f32 %v2043_v45, 0.0  ;;  %v1813_v17 = vadd.f32 %v1747_v39, %v1653_v29 }
 0x25e   : > { %v1909_v48 = vpop.f32.mrf.mxu0 }
 0x25f   : > { %2107 = vst [vmem:[%s3857_s13 + $0x70] sm:$0xff] %v2075_v11  ;;  %v1972_v0 = vadd.f32 %v1906_v4, %v1813_v17 }
 0x261   : > { %v2008_v31 = vmul.f32 %v3834_v12, %v1972_v0 }
 0x262   : > { %v1590_v51 = vpop.f32.mrf.mxu2 }
 0x263   : > { %v1750_v36 = vpop.f32.mrf.mxu3  ;;  %v2044_v49 = vadd.f32 %v3842_v60, %v2008_v31  ;;  %v1654_v18 = vadd.f32 %v1590_v51, %v1498_v14  ;;  %v1437_v46 = vpop.f32.mrf.mxu1 }
 0x264   : > { %v1499_v38 = vadd.f32 %v1437_v46, %v3668_v37 }
 0x265   : > { %v2076_v40 = vmax.f32 %v2044_v49, 0.0  ;;  %v1814_v10 = vadd.f32 %v1750_v36, %v1654_v18 }
 0x266   : > { %v1912_v61 = vpop.f32.mrf.mxu0 }
 0x267   : > { %2108 = vst [vmem:[%s3857_s13 + $0x78] sm:$0xff] %v2076_v40  ;;  %v1973_v23 = vadd.f32 %v1909_v48, %v1814_v10 }
 0x269   : > { %v2009_v1 = vmul.f32 %v3834_v12, %v1973_v23 }
 0x26a   : > { %v1593_v15 = vpop.f32.mrf.mxu2 }
 0x26b   : > { %v1753_v9 = vpop.f32.mrf.mxu3  ;;  %v2045_v55 = vadd.f32 %v3842_v60, %v2009_v1  ;;  %v1655_v32 = vadd.f32 %v1593_v15, %v1499_v38  ;;  %v1440_v54 = vpop.f32.mrf.mxu1 }
 0x26c   : > { %v1500_v16 = vadd.f32 %v1440_v54, %v3679_v5 }
 0x26d   : > { %v2077_v13 = vmax.f32 %v2045_v55, 0.0  ;;  %v1815_v41 = vadd.f32 %v1753_v9, %v1655_v32 }
 0x26e   : > { %v1915_v24 = vpop.f32.mrf.mxu0 }
 0x26f   : > { %2109 = vst [vmem:[%s3857_s13 + $0x80] sm:$0xff] %v2077_v13  ;;  %v1974_v50 = vadd.f32 %v1912_v61, %v1815_v41 }
 0x271   : > { %v2010_v62 = vmul.f32 %v3834_v12, %v1974_v50 }
 0x272   : > { %v1596_v58 = vpop.f32.mrf.mxu2 }
 0x273   : > { %v1756_v37 = vpop.f32.mrf.mxu3  ;;  %v2046_v22 = vadd.f32 %v3842_v60, %v2010_v62  ;;  %v1656_v63 = vadd.f32 %v1596_v58, %v1500_v16  ;;  %v1443_v57 = vpop.f32.mrf.mxu1 }
 0x274   : > { %v1501_v26 = vadd.f32 %v1443_v57, %v3690_v52 }
 0x275   : > { %v2078_v20 = vmax.f32 %v2046_v22, 0.0  ;;  %v1816_v47 = vadd.f32 %v1756_v37, %v1656_v63 }
 0x276   : > { %v1918_v21 = vpop.f32.mrf.mxu0 }
 0x277   : > { %2110 = vst [vmem:[%s3857_s13 + $0x88] sm:$0xff] %v2078_v20  ;;  %v1975_v7 = vadd.f32 %v1915_v24, %v1816_v47 }
 0x279   : > { %v2011_v4 = vmul.f32 %v3834_v12, %v1975_v7 }
 0x27a   : > { %v1599_v8 = vpop.f32.mrf.mxu2 }
 0x27b   : > { %v1759_v5 = vpop.f32.mrf.mxu3  ;;  %v2047_v19 = vadd.f32 %v3842_v60, %v2011_v4  ;;  %v1657_v28 = vadd.f32 %v1599_v8, %v1501_v26  ;;  %v1446_v2 = vpop.f32.mrf.mxu1 }
 0x27c   : > { %v1502_v43 = vadd.f32 %v1446_v2, %v3701_v33 }
 0x27d   : > { %v2079_v34 = vmax.f32 %v2047_v19, 0.0  ;;  %v1817_v39 = vadd.f32 %v1759_v5, %v1657_v28 }
 0x27e   : > { %v1921_v45 = vpop.f32.mrf.mxu0 }
 0x27f   : > { %2111 = vst [vmem:[%s3857_s13 + $0x90] sm:$0xff] %v2079_v34  ;;  %v1976_v29 = vadd.f32 %v1918_v21, %v1817_v39 }
 0x281   : > { %v2012_v11 = vmul.f32 %v3834_v12, %v1976_v29 }
 0x282   : > { %v1602_v17 = vpop.f32.mrf.mxu2 }
 0x283   : > { %v1762_v52 = vpop.f32.mrf.mxu3  ;;  %v2048_v48 = vadd.f32 %v3842_v60, %v2012_v11  ;;  %v1658_v0 = vadd.f32 %v1602_v17, %v1502_v43  ;;  %v1449_v14 = vpop.f32.mrf.mxu1 }
 0x284   : > { %v1503_v18 = vadd.f32 %v1449_v14, %v3712_v3 }
 0x285   : > { %v2080_v31 = vmax.f32 %v2048_v48, 0.0  ;;  %v1818_v51 = vadd.f32 %v1762_v52, %v1658_v0 }
 0x286   : > { %v1924_v36 = vpop.f32.mrf.mxu0 }
 0x287   : > { %2112 = vst [vmem:[%s3857_s13 + $0x98] sm:$0xff] %v2080_v31  ;;  %v1977_v49 = vadd.f32 %v1921_v45, %v1818_v51 }
 0x289   : > { %v2013_v46 = vmul.f32 %v3834_v12, %v1977_v49 }
 0x28a   : > { %v1605_v40 = vpop.f32.mrf.mxu2 }
 0x28b   : > { %v1765_v33 = vpop.f32.mrf.mxu3  ;;  %v2049_v10 = vadd.f32 %v3842_v60, %v2013_v46  ;;  %v1659_v61 = vadd.f32 %v1605_v40, %v1503_v18  ;;  %v1452_v23 = vpop.f32.mrf.mxu1 }
 0x28c   : > { %v1504_v55 = vadd.f32 %v1452_v23, %v3723_v56 }
 0x28d   : > { %v2081_v38 = vmax.f32 %v2049_v10, 0.0  ;;  %v1819_v1 = vadd.f32 %v1765_v33, %v1659_v61 }
 0x28e   : > { %v1927_v15 = vpop.f32.mrf.mxu0 }
 0x28f   : > { %2113 = vst [vmem:[%s3857_s13 + $0xa0] sm:$0xff] %v2081_v38  ;;  %v1978_v9 = vadd.f32 %v1924_v36, %v1819_v1 }
 0x291   : > { %v2014_v32 = vmul.f32 %v3834_v12, %v1978_v9 }
 0x292   : > { %v1608_v54 = vpop.f32.mrf.mxu2 }
 0x293   : > { %v1768_v3 = vpop.f32.mrf.mxu3  ;;  %v2050_v13 = vadd.f32 %v3842_v60, %v2014_v32  ;;  %v1660_v41 = vadd.f32 %v1608_v54, %v1504_v55  ;;  %v1455_v24 = vpop.f32.mrf.mxu1 }
 0x294   : > { %v1505_v37 = vadd.f32 %v1455_v24, %v3734_v25 }
 0x295   : > { %v2082_v50 = vmax.f32 %v2050_v13, 0.0  ;;  %v1820_v16 = vadd.f32 %v1768_v3, %v1660_v41 }
 0x296   : > { %v1930_v62 = vpop.f32.mrf.mxu0 }
 0x297   : > { %2114 = vst [vmem:[%s3857_s13 + $0xa8] sm:$0xff] %v2082_v50  ;;  %v1979_v58 = vadd.f32 %v1927_v15, %v1820_v16 }
 0x299   : > { %v2015_v22 = vmul.f32 %v3834_v12, %v1979_v58 }
 0x29a   : > { %v1611_v63 = vpop.f32.mrf.mxu2 }
 0x29b   : > { %v1771_v56 = vpop.f32.mrf.mxu3  ;;  %v2051_v57 = vadd.f32 %v3842_v60, %v2015_v22  ;;  %v1661_v20 = vadd.f32 %v1611_v63, %v1505_v37  ;;  %v1458_v47 = vpop.f32.mrf.mxu1 }
 0x29c   : > { %v1506_v8 = vadd.f32 %v1458_v47, %v3745_v44 }
 0x29d   : > { %v2083_v21 = vmax.f32 %v2051_v57, 0.0  ;;  %v1821_v7 = vadd.f32 %v1771_v56, %v1661_v20 }
 0x29e   : > { %v1933_v26 = vpop.f32.mrf.mxu0 }
 0x29f   : > { %2115 = vst [vmem:[%s3857_s13 + $0xb0] sm:$0xff] %v2083_v21  ;;  %v1980_v4 = vadd.f32 %v1930_v62, %v1821_v7 }
 0x2a1   : > { %v2016_v5 = vmul.f32 %v3834_v12, %v1980_v4 }
 0x2a2   : > { %v1614_v19 = vpop.f32.mrf.mxu2 }
 0x2a3   : > { %v1774_v25 = vpop.f32.mrf.mxu3  ;;  %v2052_v28 = vadd.f32 %v3842_v60, %v2016_v5  ;;  %v1662_v2 = vadd.f32 %v1614_v19, %v1506_v8  ;;  %v1461_v34 = vpop.f32.mrf.mxu1 }
 0x2a4   : > { %v1507_v11 = vadd.f32 %v1461_v34, %v3756_v35 }
 0x2a5   : > { %v2084_v39 = vmax.f32 %v2052_v28, 0.0  ;;  %v1822_v45 = vadd.f32 %v1774_v25, %v1662_v2 }
 0x2a6   : > { %v1936_v29 = vpop.f32.mrf.mxu0 }
 0x2a7   : > { %2116 = vst [vmem:[%s3857_s13 + $0xb8] sm:$0xff] %v2084_v39  ;;  %v1981_v43 = vadd.f32 %v1933_v26, %v1822_v45 }
 0x2a9   : > { %v2017_v17 = vmul.f32 %v3834_v12, %v1981_v43 }
 0x2aa   : > { %v1617_v52 = vpop.f32.mrf.mxu2 }
 0x2ab   : > { %v1777_v44 = vpop.f32.mrf.mxu3  ;;  %v2053_v48 = vadd.f32 %v3842_v60, %v2017_v17  ;;  %v1663_v0 = vadd.f32 %v1617_v52, %v1507_v11  ;;  %v1464_v14 = vpop.f32.mrf.mxu1 }
 0x2ac   : > { %v1508_v18 = vadd.f32 %v1464_v14, %v3767_v53 }
 0x2ad   : > { %v2085_v31 = vmax.f32 %v2053_v48, 0.0  ;;  %v1823_v51 = vadd.f32 %v1777_v44, %v1663_v0 }
 0x2ae   : > { %v1939_v36 = vpop.f32.mrf.mxu0 }
 0x2af   : > { %2117 = vst [vmem:[%s3857_s13 + $0xc0] sm:$0xff] %v2085_v31  ;;  %v1982_v49 = vadd.f32 %v1936_v29, %v1823_v51 }
 0x2b1   : > { %v2018_v46 = vmul.f32 %v3834_v12, %v1982_v49 }
 0x2b2   : > { %v1620_v40 = vpop.f32.mrf.mxu2 }
 0x2b3   : > { %v1780_v35 = vpop.f32.mrf.mxu3  ;;  %v2054_v33 = vadd.f32 %v3842_v60, %v2018_v46  ;;  %v1664_v10 = vadd.f32 %v1620_v40, %v1508_v18  ;;  %v1467_v61 = vpop.f32.mrf.mxu1 }
 0x2b4   : > { %v1509_v9 = vadd.f32 %v1467_v61, %v3778_v42 }
 0x2b5   : > { %v2086_v23 = vmax.f32 %v2054_v33, 0.0  ;;  %v1824_v38 = vadd.f32 %v1780_v35, %v1664_v10 }
 0x2b6   : > { %v1942_v1 = vpop.f32.mrf.mxu0 }
 0x2b7   : > { %2118 = vst [vmem:[%s3857_s13 + $0xc8] sm:$0xff] %v2086_v23  ;;  %v1983_v15 = vadd.f32 %v1939_v36, %v1824_v38 }
 0x2b9   : > { %v2019_v55 = vmul.f32 %v3834_v12, %v1983_v15 }
 0x2ba   : > { %v1623_v32 = vpop.f32.mrf.mxu2 }
 0x2bb   : > { %v1783_v53 = vpop.f32.mrf.mxu3  ;;  %v2055_v54 = vadd.f32 %v3842_v60, %v2019_v55  ;;  %v1665_v3 = vadd.f32 %v1623_v32, %v1509_v9  ;;  %v1470_v13 = vpop.f32.mrf.mxu1 }
 0x2bc   : > { %v1510_v62 = vadd.f32 %v1470_v13, %v3789_v30 }
 0x2bd   : > { %v2087_v41 = vmax.f32 %v2055_v54, 0.0  ;;  %v1825_v24 = vadd.f32 %v1783_v53, %v1665_v3 }
 0x2be   : > { %v1945_v50 = vpop.f32.mrf.mxu0 }
 0x2bf   : > { %2119 = vst [vmem:[%s3857_s13 + $0xd0] sm:$0xff] %v2087_v41  ;;  %v1984_v16 = vadd.f32 %v1942_v1, %v1825_v24 }
 0x2c1   : > { %v2020_v58 = vmul.f32 %v3834_v12, %v1984_v16 }
 0x2c2   : > { %v1626_v37 = vpop.f32.mrf.mxu2 }
 0x2c3   : > { %v1786_v42 = vpop.f32.mrf.mxu3  ;;  %v2056_v22 = vadd.f32 %v3842_v60, %v2020_v58  ;;  %v1666_v63 = vadd.f32 %v1626_v37, %v1510_v62  ;;  %v1473_v56 = vpop.f32.mrf.mxu1 }
 0x2c4   : > { %v1511_v7 = vadd.f32 %v1473_v56, %v3800_v59 }
 0x2c5   : > { %v2088_v57 = vmax.f32 %v2056_v22, 0.0  ;;  %v1826_v20 = vadd.f32 %v1786_v42, %v1666_v63 }
 0x2c6   : > { %v1948_v21 = vpop.f32.mrf.mxu0 }
 0x2c7   : > { %2120 = vst [vmem:[%s3857_s13 + $0xd8] sm:$0xff] %v2088_v57  ;;  %v1985_v47 = vadd.f32 %v1945_v50, %v1826_v20 }
 0x2c9   : > { %v2021_v26 = vmul.f32 %v3834_v12, %v1985_v47 }
 0x2ca   : > { %v1629_v4 = vpop.f32.mrf.mxu2 }
 0x2cb   : > { %v1789_v30 = vpop.f32.mrf.mxu3  ;;  %v2057_v8 = vadd.f32 %v3842_v60, %v2021_v26  ;;  %v1667_v5 = vadd.f32 %v1629_v4, %v1511_v7  ;;  %v1476_v19 = vpop.f32.mrf.mxu1 }
 0x2cc   : > { %v1512_v34 = vadd.f32 %v1476_v19, %v3811_v6 }
 0x2cd   : > { %v2089_v25 = vmax.f32 %v2057_v8, 0.0  ;;  %v1827_v28 = vadd.f32 %v1789_v30, %v1667_v5 }
 0x2ce   : > { %v1951_v45 = vpop.f32.mrf.mxu0 }
 0x2cf   : > { %2121 = vst [vmem:[%s3857_s13 + $0xe0] sm:$0xff] %v2089_v25  ;;  %v1986_v2 = vadd.f32 %v1948_v21, %v1827_v28 }
 0x2d1   : > { %v2022_v39 = vmul.f32 %v3834_v12, %v1986_v2 }
 0x2d2   : > { %v1632_v59 = vpop.f32.mrf.mxu2 }
 0x2d3   : > { %v1792_v29 = vpop.f32.mrf.mxu3  ;;  %v2058_v43 = vadd.f32 %v3842_v60, %v2022_v39  ;;  %v1668_v11 = vadd.f32 %v1632_v59, %v1512_v34  ;;  %v1479_v44 = vpop.f32.mrf.mxu1 }
 0x2d4   : > { %v1513_v0 = vadd.f32 %v1479_v44, %v3822_v27 }
 0x2d5   : > { %v2090_v17 = vmax.f32 %v2058_v43, 0.0  ;;  %v1828_v52 = vadd.f32 %v1792_v29, %v1668_v11 }
 0x2d6   : > { %v1954_v49 = vpop.f32.mrf.mxu0 }
 0x2d7   : > { %2122 = vst [vmem:[%s3857_s13 + $0xe8] sm:$0xff] %v2090_v17  ;;  %v1987_v48 = vadd.f32 %v1951_v45, %v1828_v52 }
 0x2d9   : > { %v2023_v6 = vmul.f32 %v3834_v12, %v1987_v48 }
 0x2da   : > { %v1635_v14 = vpop.f32.mrf.mxu2 }
 0x2db   : > { %v1795_v31 = vpop.f32.mrf.mxu3  ;;  %v2059_v51 = vadd.f32 %v3842_v60, %v2023_v6  ;;  %v1669_v36 = vadd.f32 %v1635_v14, %v1513_v0 }
 0x2dd   : > { %v2091_v18 = vmax.f32 %v2059_v51, 0.0  ;;  %v1829_v46 = vadd.f32 %v1795_v31, %v1669_v36 }
 0x2df   : > { %2123 = vst [vmem:[%s3857_s13 + $0xf0] sm:$0xff] %v2091_v18  ;;  %v1988_v27 = vadd.f32 %v1954_v49, %v1829_v46 }
 0x2e1   : > { %v2024_v40 = vmul.f32 %v3834_v12, %v1988_v27 }
 0x2e3   : > { %v2060_v35 = vadd.f32 %v3842_v60, %v2024_v40 }
 0x2e5   : > { %v2092_v33 = vmax.f32 %v2060_v35, 0.0 }
 0x2e7   : > { %2124 = vst [vmem:[%s3857_s13 + $0xf8] sm:$0xff] %v2092_v33 }
 0x2e8   : > { %2618 = shalt.err (!%p2615_p3)
}
 0x2e9   : > { %s2655_s9 = smov 128   ;;  %s2656_s11 = smov 8  }
 0x2ea   : > { %2524 = dma.vmem_to_hbm [thread:$0]  (%p2720_p5), %s2139_s27, 4096, %s2141_s28, %s2126_s19, %s2655_s9, %s2655_s9, %s2656_s11  }
 0x2eb PF: > { %p2530_p4 = scmp.ge.s32.totalorder %s2653_s18, 2  ;;  %s2155_s12 = sand.u32 1, %s2641_s15  }
 0x2ec   : > { %s2156_s13 = scalar_lea.sflag [#allocation3], %s2155_s12 }
 0x2ed   : > { %p2527_p7 = pnand %p2530_p4, %p2724_p6 }
 0x2ef   : > { %p2528_p8 = pneg %p2527_p7 }
 0x2f1   : > { %2636 = dma.done.wait (%p2528_p8), %s2156_s13, 4096  }
 0x2f2   : > { %2638 = vsyncadd (%p2528_p8), %s2156_s13, 4294963200  ;;  %p14_p9 = scmp.ge.s32.totalorder %s2707_s21, 4   ;;  %s4349_s15 = smov %s2645_s16 }
 0x2f3   : > { %s4350_s16 = smov %s2649_s17  ;;  %s4351_s17 = smov %s2718_s24 }
 0x2f4   : > { %s4352_s18 = smov %s2707_s21  ;;  %16 = sbr.rel (!%p14_p9) target bundleno = 3 (0x3), region = 79 }
 0x2f9   :  { %2162 = vsyncpa [#allocation3], 1 }
 0x2fa   :  { %2164 = vsyncpa [#allocation3 + $0x1], 1 }

</bundles_post_ra>
